<compile_context>
chip_gen: v7x
topology: tpu7x:2x2x1
jax: 0.10.0
libtpu: 0.0.40
codegen_flags: <defaults>
</compile_context>

<pallas_src>
import functools

import jax
import jax.numpy as jnp
from jax import lax
from jax.experimental import pallas as pl
from jax.experimental.pallas import tpu as pltpu

_VMEM_LIMIT = 48 * 1024 * 1024


# --------------------------------------------------------------------------
# Tiling helpers
# --------------------------------------------------------------------------

def _round_up(x, m):
    return (x + m - 1) // m * m


def _pick_tile(dim, target, quantum):
    """Largest tile <= target dividing `dim`, multiple of `quantum` (or the
    full dim when dim <= target).  None if impossible."""
    if dim <= target:
        return dim
    t = (target // quantum) * quantum
    while t >= quantum:
        if dim % t == 0:
            return t
        t -= quantum
    return None


def _rows_plan(m, target):
    t = _pick_tile(m, target, 8)
    if t is not None:
        return t, m
    t = max(8, (min(target, m) // 8) * 8)
    return t, _round_up(m, t)


def _row_target(c, budget=2 << 20):
    return max(64, min(4096, budget // (2 * c)))


def _divisor_at_most(n, t):
    t = max(1, min(n, t))
    while n % t:
        t -= 1
    return t


# --------------------------------------------------------------------------
# Tiled matmul with fused bias / activation / BN-statistics epilogue
# --------------------------------------------------------------------------

def _matmul_kernel(x_ref, w_ref, b_ref, *refs, activation, want_stats):
    if want_stats:
        o_ref, s_ref, q_ref, acc_ref = refs
    else:
        o_ref, acc_ref = refs
        s_ref = q_ref = None
    k = pl.program_id(2)

    @pl.when(k == 0)
    def _():
        acc_ref[...] = jnp.zeros_like(acc_ref)

    acc_ref[...] += jnp.dot(x_ref[...], w_ref[...],
                            preferred_element_type=jnp.float32)

    @pl.when(k == pl.num_programs(2) - 1)
    def _():
        y = acc_ref[...] + b_ref[...]
        if activation == "relu":
            y = jnp.maximum(y, 0.0)
        elif activation == "sigmoid":
            e = jnp.exp(-jnp.abs(y))
            y = jnp.where(y >= 0, 1.0 / (1.0 + e), e / (1.0 + e))
        if want_stats:
            s_ref[...] = jnp.sum(y, axis=0).reshape(1, 1, -1)
            q_ref[...] = jnp.sum(y * y, axis=0).reshape(1, 1, -1)
        o_ref[...] = y.astype(o_ref.dtype)


def pallas_matmul(x, w, bias, activation="none", out_dtype=jnp.bfloat16,
                  want_stats=False):
    """act(x @ w + bias); optionally also returns per-channel (sum, sumsq)
    of the pre-activation output (BN-stats fusion; callers requesting stats
    must use bias=None and activation='none' so zero-padded rows are exact)."""
    M, K = x.shape
    K2, N = w.shape
    assert K == K2, (K, K2)

    tm, Mp = _rows_plan(M, 256)
    if Mp != M:
        x = jnp.pad(x, ((0, Mp - M), (0, 0)))
    tk = _pick_tile(K, 512, 128) if K % 128 == 0 else K
    tn = _pick_tile(N, 512, 128) if N % 128 == 0 else N
    gi = Mp // tm
    grid = (gi, N // tn, K // tk)
    b = bias if bias is not None else jnp.zeros((N,), jnp.float32)

    out_shapes = [jax.ShapeDtypeStruct((Mp, N), out_dtype)]
    out_specs = [pl.BlockSpec((tm, tn), lambda i, j, k: (i, j))]
    if want_stats:
        out_shapes += [jax.ShapeDtypeStruct((gi, 1, N), jnp.float32)] * 2
        out_specs += [pl.BlockSpec((1, 1, tn), lambda i, j, k: (i, 0, j))] * 2

    outs = pl.pallas_call(
        functools.partial(_matmul_kernel, activation=activation,
                          want_stats=want_stats),
        out_shape=tuple(out_shapes) if want_stats else out_shapes[0],
        grid_spec=pltpu.PrefetchScalarGridSpec(
            num_scalar_prefetch=0,
            grid=grid,
            in_specs=[
                pl.BlockSpec((tm, tk), lambda i, j, k: (i, k)),
                pl.BlockSpec((tk, tn), lambda i, j, k: (k, j)),
                pl.BlockSpec((1, tn), lambda i, j, k: (0, j)),
            ],
            out_specs=tuple(out_specs) if want_stats else out_specs[0],
            scratch_shapes=[pltpu.VMEM((tm, tn), jnp.float32)]),
        compiler_params=pltpu.CompilerParams(
            dimension_semantics=("parallel", "parallel", "arbitrary"),
            vmem_limit_bytes=_VMEM_LIMIT),
    )(x.astype(jnp.bfloat16), w.astype(jnp.bfloat16),
      b.reshape(1, N).astype(jnp.float32))

    if want_stats:
        y, s, q = outs
        if Mp != M:
            y = y[:M]
        return y, jnp.sum(s, axis=(0, 1)), jnp.sum(q, axis=(0, 1))
    y = outs
    if Mp != M:
        y = y[:M]
    return y


# --------------------------------------------------------------------------
# Implicit-GEMM 3x3 stride-1 convolution (no im2col, no HBM pre-pad)
# --------------------------------------------------------------------------

def _above_map(step, hmax):
    def m(n, i, *_):
        return (n, jnp.maximum(i * step - 1, 0), 0, 0)
    return m


def _below_map(step, hmax):
    def m(n, i, *_):
        return (n, jnp.minimum((i + 1) * step, hmax - 1), 0, 0)
    return m


def _conv3x3_s1_kernel(*refs, nsrc, cins, th, wo, activation, want_stats):
    nin = 3 * nsrc
    w_ref, b_ref, o_ref = refs[nin], refs[nin + 1], refs[nin + 2]
    i = pl.program_id(1)
    last = pl.num_programs(1) - 1
    tn = o_ref.shape[-1]
    ctot = sum(cins)

    # Assemble per-source (th+2, W+2, Cs) strips in VMEM; the boundary rows
    # (virtual zero padding of the conv) are zero-gated, the width padding is
    # synthesized with zero columns.
    strips = []
    for s in range(nsrc):
        main = refs[3 * s][0]                       # (th, W, Cs)
        above = refs[3 * s + 1][0]                  # (1, W, Cs)
        below = refs[3 * s + 2][0]                  # (1, W, Cs)
        dt = main.dtype
        above = above * (i != 0).astype(dt)
        below = below * (i != last).astype(dt)
        strip = jnp.concatenate([above, main, below], axis=0)
        zc = jnp.zeros((th + 2, 1, cins[s]), dt)
        strips.append(jnp.concatenate([zc, strip, zc], axis=1))

    acc = jnp.zeros((th * wo, tn), jnp.float32)
    for dy in range(3):
        for dx in range(3):
            coff = 0
            for s in range(nsrc):
                cs = cins[s]
                piece = strips[s][dy:dy + th, dx:dx + wo, :]
                piece = piece.reshape(th * wo, cs)
                woff = (dy * 3 + dx) * ctot + coff
                acc = acc + jnp.dot(piece, w_ref[woff:woff + cs, :],
                                    preferred_element_type=jnp.float32)
                coff += cs

    y = acc + b_ref[...]
    if activation == "relu":
        y = jnp.maximum(y, 0.0)
    if want_stats:
        refs[nin + 3][...] = jnp.sum(y, axis=0).reshape(1, 1, 1, tn)
        refs[nin + 4][...] = jnp.sum(y * y, axis=0).reshape(1, 1, 1, tn)
    o_ref[...] = y.astype(o_ref.dtype).reshape(1, th, wo, tn)


def conv3x3_s1(xs, cw, bias=None, activation="none", want_stats=False):
    """3x3, stride 1, pad 1 conv over one or more channel-concatenated NHWC
    sources (the decoder skip-concat is folded in, never materialized)."""
    if not isinstance(xs, (list, tuple)):
        xs = [xs]
    n, h, w, _ = xs[0].shape
    cins = tuple(int(x.shape[-1]) for x in xs)
    ctot = sum(cins)
    K, cout = cw["wm"].shape
    assert K == 9 * ctot, (K, ctot)
    ho, wo = h, w

    # cout tile: lane-dense (multiple of 128) whenever cout allows.
    if cout % 128 == 0:
        tn = 256 if (cout % 256 == 0 and K * 256 * 2 <= (6 << 20)) else 128
    else:
        tn = cout
    # output-row tile: divisor of HO, ~256 GEMM rows, strip fits VMEM budget.
    th = _divisor_at_most(ho, max(1, 256 // max(wo, 1)))
    while th > 1 and (th + 2) * (w + 2) * ctot * 2 > (4 << 20):
        th = _divisor_at_most(ho, max(1, th // 2))

    grid = (n, ho // th, cout // tn)

    args, in_specs = [], []
    for x, cs in zip(xs, cins):
        args += [x, x, x]
        in_specs += [
            pl.BlockSpec((1, th, w, cs), lambda ni, i, j: (ni, i, 0, 0)),
            pl.BlockSpec((1, 1, w, cs), _above_map(th, h)),
            pl.BlockSpec((1, 1, w, cs), _below_map(th, h)),
        ]
    b = bias if bias is not None else jnp.zeros((cout,), jnp.float32)
    args += [cw["wm"], b.reshape(1, cout).astype(jnp.float32)]
    in_specs += [
        pl.BlockSpec((K, tn), lambda ni, i, j: (0, j)),
        pl.BlockSpec((1, tn), lambda ni, i, j: (0, j)),
    ]

    out_shapes = [jax.ShapeDtypeStruct((n, ho, wo, cout), jnp.bfloat16)]
    out_specs = [pl.BlockSpec((1, th, wo, tn), lambda ni, i, j: (ni, i, 0, j))]
    if want_stats:
        out_shapes += [jax.ShapeDtypeStruct((n, ho // th, 1, cout),
                                            jnp.float32)] * 2
        out_specs += [pl.BlockSpec((1, 1, 1, tn),
                                   lambda ni, i, j: (ni, i, 0, j))] * 2

    outs = pl.pallas_call(
        functools.partial(_conv3x3_s1_kernel, nsrc=len(xs), cins=cins, th=th,
                          wo=wo, activation=activation, want_stats=want_stats),
        out_shape=tuple(out_shapes) if want_stats else out_shapes[0],
        grid_spec=pltpu.PrefetchScalarGridSpec(
            num_scalar_prefetch=0, grid=grid,
            in_specs=in_specs,
            out_specs=tuple(out_specs) if want_stats else out_specs[0]),
        compiler_params=pltpu.CompilerParams(
            dimension_semantics=("parallel", "parallel", "parallel"),
            vmem_limit_bytes=_VMEM_LIMIT),
    )(*args)

    if want_stats:
        y, s, q = outs
        return y, jnp.sum(s, axis=(0, 1, 2)), jnp.sum(q, axis=(0, 1, 2))
    return outs


# --------------------------------------------------------------------------
# ConvTranspose2d(kernel=2, stride=2): interleaved output written from VMEM
# --------------------------------------------------------------------------

def _convt_kernel(x_ref, w_ref, b_ref, o_ref, *, th, w):
    cin = x_ref.shape[-1]
    tn = o_ref.shape[-1]
    xf = x_ref[0].reshape(th * w, cin)
    b = b_ref[...]
    ys = []
    for dd in range(4):                       # dd = dy*2 + dx
        y = jnp.dot(xf, w_ref[dd], preferred_element_type=jnp.float32) + b
        ys.append(y.astype(o_ref.dtype).reshape(th, w, 1, tn))
    row0 = jnp.concatenate([ys[0], ys[1]], axis=2).reshape(th, 1, 2 * w, tn)
    row1 = jnp.concatenate([ys[2], ys[3]], axis=2).reshape(th, 1, 2 * w, tn)
    out = jnp.concatenate([row0, row1], axis=1).reshape(1, 2 * th, 2 * w, tn)
    o_ref[...] = out


def conv_transpose_2x2_s2(x, p):
    n, h, w, cin = x.shape
    cout = p["up_w"].shape[2]
    if cout % 128 == 0:
        tn = 256 if (cout % 256 == 0 and 4 * cin * 256 * 2 <= (6 << 20)) else 128
    else:
        tn = cout
    th = _divisor_at_most(h, max(1, 256 // max(w, 1)))
    grid = (n, h // th, cout // tn)
    return pl.pallas_call(
        functools.partial(_convt_kernel, th=th, w=w),
        out_shape=jax.ShapeDtypeStruct((n, 2 * h, 2 * w, cout), jnp.bfloat16),
        grid_spec=pltpu.PrefetchScalarGridSpec(
            num_scalar_prefetch=0, grid=grid,
            in_specs=[
                pl.BlockSpec((1, th, w, cin), lambda ni, i, j: (ni, i, 0, 0)),
                pl.BlockSpec((4, cin, tn), lambda ni, i, j: (0, 0, j)),
                pl.BlockSpec((1, tn), lambda ni, i, j: (0, j)),
            ],
            out_specs=pl.BlockSpec((1, 2 * th, 2 * w, tn),
                                   lambda ni, i, j: (ni, i, 0, j))),
        compiler_params=pltpu.CompilerParams(
            dimension_semantics=("parallel", "parallel", "parallel"),
            vmem_limit_bytes=_VMEM_LIMIT),
    )(x, p["up_w"], p["up_b"].reshape(1, cout).astype(jnp.float32))


# --------------------------------------------------------------------------
# MaxPool2d(kernel=3, stride=2, padding=1) -- single kernel, no HBM slices
# --------------------------------------------------------------------------

def _pool_above_map(step, hmax):
    def m(n, i, *_):
        return (n, jnp.maximum(i * step - 1, 0), 0, 0, 0)
    return m


def _maxpool_kernel(m_ref, a_ref, o_ref, *, th, wo, c):
    i = pl.program_id(1)
    dt = m_ref.dtype
    neg = jnp.asarray(-1e30, dt)
    main = m_ref[0]                           # (th, 2, wo, 2c)
    r0 = main[:, 0]                           # input rows 2t
    r1 = main[:, 1]                           # input rows 2t + 1
    ab = a_ref[...][0, 0, 1]                  # input row 2*h0 - 1
    gate = (i != 0).astype(dt)
    ab = ab * gate + neg * (1.0 - gate)
    if th > 1:
        rm1 = jnp.concatenate([ab[None], r1[:-1]], axis=0)   # rows 2t - 1
    else:
        rm1 = ab[None]

    negcol = jnp.full((th, 1, c), neg, dt)

    def cmax(r):                              # r: (th, wo, 2c)
        even = r[:, :, :c]                    # cols 2q
        odd = r[:, :, c:]                     # cols 2q + 1
        oddl = jnp.concatenate([negcol, odd[:, :-1, :]], axis=1)  # cols 2q - 1
        return jnp.maximum(jnp.maximum(even, odd), oddl)

    y = jnp.maximum(jnp.maximum(cmax(rm1), cmax(r0)), cmax(r1))
    o_ref[...] = y.reshape(1, th, wo, c)


def pallas_maxpool_3x3_s2(x):
    n, h, w, c = x.shape
    assert h % 2 == 0 and w % 2 == 0 and w >= 4
    ho, wo = h // 2, w // 2
    xf = x.reshape(n, ho, 2, wo, 2 * c)       # pure reshape, no data movement
    th = _divisor_at_most(ho, max(1, (1 << 20) // max(2 * wo * 2 * c * 2, 1)))
    grid = (n, ho // th)
    return pl.pallas_call(
        functools.partial(_maxpool_kernel, th=th, wo=wo, c=c),
        out_shape=jax.ShapeDtypeStruct((n, ho, wo, c), x.dtype),
        grid_spec=pltpu.PrefetchScalarGridSpec(
            num_scalar_prefetch=0, grid=grid,
            in_specs=[
                pl.BlockSpec((1, th, 2, wo, 2 * c),
                             lambda ni, i: (ni, i, 0, 0, 0)),
                pl.BlockSpec((1, 1, 2, wo, 2 * c), _pool_above_map(th, ho)),
            ],
            out_specs=pl.BlockSpec((1, th, wo, c),
                                   lambda ni, i: (ni, i, 0, 0))),
        compiler_params=pltpu.CompilerParams(
            dimension_semantics=("parallel", "parallel"),
            vmem_limit_bytes=_VMEM_LIMIT),
    )(xf, xf)


# --------------------------------------------------------------------------
# BatchNorm normalize pass (stats supplied by the producing conv kernel)
# --------------------------------------------------------------------------

def _bn_norm_kernel(*refs, relu, has_res):
    x_ref, scale_ref, shift_ref = refs[0], refs[1], refs[2]
    o_ref = refs[-1]
    y = x_ref[...].astype(jnp.float32) * scale_ref[...] + shift_ref[...]
    if has_res:
        y = y + refs[3][...].astype(jnp.float32)
    if relu:
        y = jnp.maximum(y, 0.0)
    o_ref[...] = y.astype(o_ref.dtype)


def pallas_batchnorm(x_nhwc, bn, relu, stats, residual=None, eps=1e-5):
    """nn.BatchNorm2d (training mode, batch stats over N*H*W) with the
    optional residual add + ReLU fused into the tiled normalize pass.  Stats
    (sum, sumsq) come fused from the producing conv kernel."""
    n, h, w, c = x_nhwc.shape
    m = n * h * w
    s, q = stats
    mean = s / m
    var = jnp.maximum(q / m - mean * mean, 0.0)   # clamp (cancellation guard)
    scale = bn["gamma"] * lax.rsqrt(var + eps)
    shift = bn["beta"] - mean * scale

    # Fold narrow channel counts (e.g. 64) to a 128-lane layout: pure reshape.
    fold = 128 // c if (c < 128 and 128 % c == 0 and m % (128 // c) == 0) else 1
    cf, mf = c * fold, m // fold
    x2 = x_nhwc.reshape(mf, cf)
    scale_f = jnp.tile(scale, fold).reshape(1, cf).astype(jnp.float32)
    shift_f = jnp.tile(shift, fold).reshape(1, cf).astype(jnp.float32)

    tr, mp = _rows_plan(mf, _row_target(cf))
    if mp != mf:
        x2 = jnp.pad(x2, ((0, mp - mf), (0, 0)))
    row_spec = pl.BlockSpec((tr, cf), lambda i: (i, 0))
    chan_spec = pl.BlockSpec((1, cf), lambda i: (0, 0))

    args = [x2, scale_f, shift_f]
    in_specs = [row_spec, chan_spec, chan_spec]
    if residual is not None:
        r2 = residual.reshape(mf, cf)
        if mp != mf:
            r2 = jnp.pad(r2, ((0, mp - mf), (0, 0)))
        args.append(r2)
        in_specs.append(row_spec)

    y = pl.pallas_call(
        functools.partial(_bn_norm_kernel, relu=relu,
                          has_res=residual is not None),
        out_shape=jax.ShapeDtypeStruct((mp, cf), jnp.bfloat16),
        grid_spec=pltpu.PrefetchScalarGridSpec(
            num_scalar_prefetch=0, grid=(mp // tr,),
            in_specs=in_specs, out_specs=row_spec),
        compiler_params=pltpu.CompilerParams(
            dimension_semantics=("parallel",),
            vmem_limit_bytes=_VMEM_LIMIT),
    )(*args)
    if mp != mf:
        y = y[:mf]
    return y.reshape(n, h, w, c)


# --------------------------------------------------------------------------
# Conv wrappers
# --------------------------------------------------------------------------

def _im2col(xs, kh, kw, stride, pad):
    n, h, w, _ = xs[0].shape
    if pad:
        xs = [jnp.pad(x, ((0, 0), (pad, pad), (pad, pad), (0, 0))) for x in xs]
    ho = (h + 2 * pad - kh) // stride + 1
    wo = (w + 2 * pad - kw) // stride + 1
    cols = []
    for dy in range(kh):
        for dx in range(kw):
            for x in xs:
                cols.append(x[:, dy:dy + stride * (ho - 1) + 1:stride,
                              dx:dx + stride * (wo - 1) + 1:stride, :])
    cols = jnp.concatenate(cols, axis=-1).reshape(n * ho * wo, -1)
    return cols, (n, ho, wo)


def conv1x1(x, cw, bias=None, stride=1, activation="none",
            want_stats=False, out_dtype=jnp.bfloat16):
    if stride != 1:
        x = x[:, ::stride, ::stride, :]
    n, h, w, c = x.shape
    cout = cw["wm"].shape[1]
    res = pallas_matmul(x.reshape(n * h * w, c), cw["wm"], bias,
                        activation, out_dtype, want_stats)
    if want_stats:
        y, s, q = res
        return y.reshape(n, h, w, cout), s, q
    return res.reshape(n, h, w, cout)


def conv_im2col(xs, cw, bias, stride, pad, activation="none",
                want_stats=False, out_dtype=jnp.bfloat16):
    if not isinstance(xs, (list, tuple)):
        xs = [xs]
    cols, (n, ho, wo) = _im2col(xs, cw["kh"], cw["kw"], stride, pad)
    cout = cw["wm"].shape[1]
    res = pallas_matmul(cols, cw["wm"], bias, activation, out_dtype, want_stats)
    if want_stats:
        y, s, q = res
        return y.reshape(n, ho, wo, cout), s, q
    return res.reshape(n, ho, wo, cout)


def conv3x3(xs, cw, bias=None, stride=1, activation="none", want_stats=False):
    if stride == 1:
        return conv3x3_s1(xs, cw, bias, activation, want_stats)
    # Only 3 stride-2 3x3 convs exist (layer2/3/4 block0), all on the smallest
    # feature maps: the im2col fallback is cheap there.
    return conv_im2col(xs, cw, bias, stride, 1, activation, want_stats)


# --------------------------------------------------------------------------
# Parameter construction (deterministic synthetic init, pre-transformed)
# --------------------------------------------------------------------------

def init_params(key):
    keys = iter(jax.random.split(key, 256))

    def conv_w(o, i, k):
        scale = (2.0 / (i * k * k)) ** 0.5
        w = jax.random.normal(next(keys), (o, i, k, k), jnp.float32) * scale
        wm = jnp.transpose(w, (2, 3, 1, 0)).reshape(k * k * i, o)
        return {"wm": wm.astype(jnp.bfloat16), "kh": k, "kw": k}

    def bn_p(c):
        return {"gamma": jnp.ones((c,), jnp.float32),
                "beta": jnp.zeros((c,), jnp.float32)}

    def bottleneck(inp, width, stride, downsample):
        p = {"w1": conv_w(width, inp, 1), "bn1": bn_p(width),
             "w2": conv_w(width, width, 3), "bn2": bn_p(width),
             "w3": conv_w(width * 4, width, 1), "bn3": bn_p(width * 4),
             "stride": stride}
        if downsample:
            p["dw"] = conv_w(width * 4, inp, 1)
            p["dbn"] = bn_p(width * 4)
        return p

    def layer(inp, width, blocks, stride):
        blks = [bottleneck(inp, width, stride, True)]
        for _ in range(blocks - 1):
            blks.append(bottleneck(width * 4, width, 1, False))
        return blks

    def decoder(inc, outc):
        up_scale = (2.0 / (inc * 4)) ** 0.5
        up = jax.random.normal(next(keys), (inc, outc, 2, 2),
                               jnp.float32) * up_scale
        up_w = jnp.transpose(up, (2, 3, 0, 1)).reshape(4, inc, outc)
        return {"up_w": up_w.astype(jnp.bfloat16),
                "up_b": jnp.zeros((outc,), jnp.float32),
                "w1": conv_w(outc, outc * 2, 3),
                "b1": jnp.zeros((outc,), jnp.float32), "bn1": bn_p(outc),
                "w2": conv_w(outc, outc, 3),
                "b2": jnp.zeros((outc,), jnp.float32), "bn2": bn_p(outc)}

    # final 1x1 conv: cout padded 1 -> 128 for lane-dense stores (sliced off)
    fw = conv_w(1, 64, 1)
    fw["wm"] = jnp.pad(fw["wm"], ((0, 0), (0, 127)))

    return {
        "stem_w": conv_w(64, 3, 7), "stem_bn": bn_p(64),
        "layer1": layer(64, 64, 3, 1),
        "layer2": layer(256, 128, 4, 2),
        "layer3": layer(512, 256, 6, 2),
        "layer4": layer(1024, 512, 3, 2),
        "dec1": decoder(2048, 1024),
        "dec2": decoder(1024, 512),
        "dec3": decoder(512, 256),
        "dec4": decoder(256, 64),
        "final_w": fw,
        "final_b": jnp.zeros((128,), jnp.float32),
    }


# --------------------------------------------------------------------------
# Network forward
# --------------------------------------------------------------------------

def bottleneck_fwd(x, p):
    y, s, q = conv1x1(x, p["w1"], want_stats=True)
    y = pallas_batchnorm(y, p["bn1"], relu=True, stats=(s, q))
    y, s, q = conv3x3(y, p["w2"], stride=p["stride"], want_stats=True)
    y = pallas_batchnorm(y, p["bn2"], relu=True, stats=(s, q))
    y, s, q = conv1x1(y, p["w3"], want_stats=True)
    if "dw" in p:
        idn, si, qi = conv1x1(x, p["dw"], stride=p["stride"], want_stats=True)
        idn = pallas_batchnorm(idn, p["dbn"], relu=False, stats=(si, qi))
    else:
        idn = x
    # bn3 + residual add + ReLU fused into one tiled pass
    return pallas_batchnorm(y, p["bn3"], relu=True, residual=idn, stats=(s, q))


def layer_fwd(x, blocks):
    for p in blocks:
        x = bottleneck_fwd(x, p)
    return x


def decoder_fwd(x, skip, p):
    x = conv_transpose_2x2_s2(x, p)
    # torch.cat([x, skip], dim=1) is folded into the implicit-GEMM conv
    y, s, q = conv3x3([x, skip], p["w1"], bias=p["b1"], want_stats=True)
    y = pallas_batchnorm(y, p["bn1"], relu=True, stats=(s, q))
    y, s, q = conv3x3(y, p["w2"], bias=p["b2"], want_stats=True)
    y = pallas_batchnorm(y, p["bn2"], relu=True, stats=(s, q))
    return y


def unet_resnet50_forward(params, x_nchw):
    x = jnp.transpose(x_nchw, (0, 2, 3, 1)).astype(jnp.bfloat16)   # -> NHWC

    # encoder[0:3]: conv7x7 s2 -> bn -> relu
    x, s, q = conv_im2col(x, params["stem_w"], None, 2, 3, want_stats=True)
    x = pallas_batchnorm(x, params["stem_bn"], relu=True, stats=(s, q))
    skip0 = x
    # encoder[3]: maxpool(3, 2, 1)
    x = pallas_maxpool_3x3_s2(x)
    # encoder[4..7]: layer1..layer4
    x = layer_fwd(x, params["layer1"]); skip1 = x
    x = layer_fwd(x, params["layer2"]); skip2 = x
    x = layer_fwd(x, params["layer3"]); skip3 = x
    x = layer_fwd(x, params["layer4"])

    x = decoder_fwd(x, skip3, params["dec1"])
    x = decoder_fwd(x, skip2, params["dec2"])
    x = decoder_fwd(x, skip1, params["dec3"])
    x = decoder_fwd(x, skip0, params["dec4"])

    # final 1x1 conv + sigmoid fused in the matmul epilogue (cout padded to
    # 128 lanes, padding sliced off), f32 output
    x = conv1x1(x, params["final_w"], params["final_b"],
                activation="sigmoid", out_dtype=jnp.float32)
    x = x[..., :1]
    return jnp.transpose(x, (0, 3, 1, 2))                          # -> NCHW


# --------------------------------------------------------------------------

if __name__ == "__main__":
    key = jax.random.PRNGKey(0)
    pkey, xkey = jax.random.split(key)
    params = init_params(pkey)

    # small but architecture-consistent input: 64x64 so layer4 output is 2x2
    x = jax.random.normal(xkey, (1, 3, 64, 64), jnp.float32)

    y = unet_resnet50_forward(params, x)
    y = jax.block_until_ready(y)

    assert y.shape == (1, 1, 32, 32), y.shape
    assert bool(jnp.all(jnp.isfinite(y)))
    assert bool(jnp.all((y >= 0.0) & (y <= 1.0)))
    print("KERNEL_OK")
</pallas_src>

<mosaic_0001>
module attributes {stable_mosaic.version = 11 : i64} {
  func.func @_matmul_kernel(%arg0: i32, %arg1: i32, %arg2: i32, %arg3: memref<256x147xbf16, #tpu.memory_space<vmem>>, %arg4: memref<147x64xbf16, #tpu.memory_space<vmem>>, %arg5: memref<1x64xf32, #tpu.memory_space<vmem>>, %arg6: memref<256x64xbf16, #tpu.memory_space<vmem>>, %arg7: memref<1x1x64xf32, #tpu.memory_space<vmem>>, %arg8: memref<1x1x64xf32, #tpu.memory_space<vmem>>, %arg9: memref<256x64xf32, #tpu.memory_space<vmem>>) attributes {dimension_semantics = [#tpu.dimension_semantics<parallel>, #tpu.dimension_semantics<parallel>, #tpu.dimension_semantics<arbitrary>], iteration_bounds = array<i64: 4, 1, 1>, scalar_prefetch = 0 : i64, scratch_operands = 1 : i64, tpu.core_type = #tpu.core_type<tc>, window_params = [{transform_indices = @transform_0, window_bounds = array<i64: 256, 147>}, {transform_indices = @transform_1, window_bounds = array<i64: 147, 64>}, {transform_indices = @transform_2, window_bounds = array<i64: 1, 64>}, {transform_indices = @transform_3, window_bounds = array<i64: 256, 64>}, {transform_indices = @transform_4, window_bounds = array<i64: 1, 1, 64>}, {transform_indices = @transform_5, window_bounds = array<i64: 1, 1, 64>}]} {
    %c0_i32 = arith.constant 0 : i32
    %0 = arith.cmpi eq, %arg2, %c0_i32 : i32
    %1 = arith.extui %0 : i1 to i32
    %c0_i32_0 = arith.constant 0 : i32
    %2 = arith.cmpi ne, %1, %c0_i32_0 : i32
    scf.if %2 {
      %cst_10 = arith.constant 0.000000e+00 : f32
      %12 = vector.broadcast %cst_10 : f32 to vector<256x64xf32>
      %c0_11 = arith.constant 0 : index
      %c0_12 = arith.constant 0 : index
      %13 = vector.load %arg9[%c0_11, %c0_12] : memref<256x64xf32, #tpu.memory_space<vmem>>, vector<256x64xf32>
      tpu.vector_store %arg9[%c0_11, %c0_12], %12 {strides = array<i32>} : memref<256x64xf32, #tpu.memory_space<vmem>>, vector<256x64xf32>,
    } else {
    }
    %c0 = arith.constant 0 : index
    %c0_1 = arith.constant 0 : index
    %3 = vector.load %arg9[%c0, %c0_1] : memref<256x64xf32, #tpu.memory_space<vmem>>, vector<256x64xf32>
    %c0_2 = arith.constant 0 : index
    %c0_3 = arith.constant 0 : index
    %4 = vector.load %arg3[%c0_2, %c0_3] : memref<256x147xbf16, #tpu.memory_space<vmem>>, vector<256x147xbf16>
    %c0_4 = arith.constant 0 : index
    %c0_5 = arith.constant 0 : index
    %5 = vector.load %arg4[%c0_4, %c0_5] : memref<147x64xbf16, #tpu.memory_space<vmem>>, vector<147x64xbf16>
    %cst = arith.constant dense<0.000000e+00> : vector<256x64xf32>
    %6 = tpu.matmul %4, %5, %cst {dimension_numbers = #tpu.dot_dimension_numbers<[1], [0], [0], [1], [0, 0, 1, 1], [], []>} : vector<256x147xbf16>, vector<147x64xbf16>, vector<256x64xf32> -> vector<256x64xf32>
    %7 = arith.addf %3, %6 : vector<256x64xf32>
    %c0_6 = arith.constant 0 : index
    %c0_7 = arith.constant 0 : index
    %8 = vector.load %arg9[%c0_6, %c0_7] : memref<256x64xf32, #tpu.memory_space<vmem>>, vector<256x64xf32>
    tpu.vector_store %arg9[%c0_6, %c0_7], %7 {strides = array<i32>} : memref<256x64xf32, #tpu.memory_space<vmem>>, vector<256x64xf32>,
    %c0_i32_8 = arith.constant 0 : i32
    %9 = arith.cmpi eq, %arg2, %c0_i32_8 : i32
    %10 = arith.extui %9 : i1 to i32
    %c0_i32_9 = arith.constant 0 : i32
    %11 = arith.cmpi ne, %10, %c0_i32_9 : i32
    scf.if %11 {
      %c0_10 = arith.constant 0 : index
      %c0_11 = arith.constant 0 : index
      %12 = vector.load %arg9[%c0_10, %c0_11] : memref<256x64xf32, #tpu.memory_space<vmem>>, vector<256x64xf32>
      %c0_12 = arith.constant 0 : index
      %c0_13 = arith.constant 0 : index
      %13 = vector.load %arg5[%c0_12, %c0_13] : memref<1x64xf32, #tpu.memory_space<vmem>>, vector<1x64xf32>
      %14 = vector.broadcast %13 : vector<1x64xf32> to vector<256x64xf32>
      %15 = arith.addf %12, %14 : vector<256x64xf32>
      %cst_14 = arith.constant dense<0.000000e+00> : vector<64xf32>
      %16 = vector.multi_reduction <add>, %15, %cst_14 [0] : vector<256x64xf32> to vector<64xf32>
      %17 = vector.shape_cast %16 : vector<64xf32> to vector<1x1x64xf32>
      %c0_15 = arith.constant 0 : index
      %c0_16 = arith.constant 0 : index
      %c0_17 = arith.constant 0 : index
      %18 = vector.load %arg7[%c0_15, %c0_16, %c0_17] : memref<1x1x64xf32, #tpu.memory_space<vmem>>, vector<1x1x64xf32>
      tpu.vector_store %arg7[%c0_15, %c0_16, %c0_17], %17 {strides = array<i32>} : memref<1x1x64xf32, #tpu.memory_space<vmem>>, vector<1x1x64xf32>,
      %19 = arith.mulf %15, %15 : vector<256x64xf32>
      %cst_18 = arith.constant dense<0.000000e+00> : vector<64xf32>
      %20 = vector.multi_reduction <add>, %19, %cst_18 [0] : vector<256x64xf32> to vector<64xf32>
      %21 = vector.shape_cast %20 : vector<64xf32> to vector<1x1x64xf32>
      %c0_19 = arith.constant 0 : index
      %c0_20 = arith.constant 0 : index
      %c0_21 = arith.constant 0 : index
      %22 = vector.load %arg8[%c0_19, %c0_20, %c0_21] : memref<1x1x64xf32, #tpu.memory_space<vmem>>, vector<1x1x64xf32>
      tpu.vector_store %arg8[%c0_19, %c0_20, %c0_21], %21 {strides = array<i32>} : memref<1x1x64xf32, #tpu.memory_space<vmem>>, vector<1x1x64xf32>,
      %23 = arith.truncf %15 : vector<256x64xf32> to vector<256x64xbf16>
      %c0_22 = arith.constant 0 : index
      %c0_23 = arith.constant 0 : index
      %24 = vector.load %arg6[%c0_22, %c0_23] : memref<256x64xbf16, #tpu.memory_space<vmem>>, vector<256x64xbf16>
      tpu.vector_store %arg6[%c0_22, %c0_23], %23 {strides = array<i32>} : memref<256x64xbf16, #tpu.memory_space<vmem>>, vector<256x64xbf16>,
    } else {
    }
    return
  }
  func.func @transform_0(%arg0: i32, %arg1: i32, %arg2: i32) -> (i32, i32) {
    %c0_i32 = arith.constant 0 : i32
    return %arg0, %arg2 : i32, i32
  }
  func.func @transform_1(%arg0: i32, %arg1: i32, %arg2: i32) -> (i32, i32) {
    %c0_i32 = arith.constant 0 : i32
    return %arg2, %arg1 : i32, i32
  }
  func.func @transform_2(%arg0: i32, %arg1: i32, %arg2: i32) -> (i32, i32) {
    %c0_i32 = arith.constant 0 : i32
    %c0_i32_0 = arith.constant 0 : i32
    return %c0_i32, %arg1 : i32, i32
  }
  func.func @transform_3(%arg0: i32, %arg1: i32, %arg2: i32) -> (i32, i32) {
    %c0_i32 = arith.constant 0 : i32
    return %arg0, %arg1 : i32, i32
  }
  func.func @transform_4(%arg0: i32, %arg1: i32, %arg2: i32) -> (i32, i32, i32) {
    %c0_i32 = arith.constant 0 : i32
    %c0_i32_0 = arith.constant 0 : i32
    return %arg0, %c0_i32, %arg1 : i32, i32, i32
  }
  func.func @transform_5(%arg0: i32, %arg1: i32, %arg2: i32) -> (i32, i32, i32) {
    %c0_i32 = arith.constant 0 : i32
    %c0_i32_0 = arith.constant 0 : i32
    return %arg0, %c0_i32, %arg1 : i32, i32, i32
  }
}

</mosaic_0001>

<bundles_post_ra>
// kernel: tpu_custom_call.1
= control target key start
LH: loop header
LB: loop body
LE: loop exit
PB: predicated region body
PF: predicated region fallthrough
CT: control target
= control target key end

     0   :  { %11 = vsyncpa [#allocation4], 0  ;;  %s2623_s0 = inlined_call_operand.vmem [shape: bf16[1024,147], index: 0, kind: input, shape index: {}]   ;;  %s2624_s1 = inlined_call_operand.vmem [shape: bf16[147,64], index: 1, kind: input, shape index: {}]   ;;  %s2625_s2 = inlined_call_operand.vmem [shape: f32[1,64], index: 2, kind: input, shape index: {}]   ;;  %s2626_s3 = inlined_call_operand.vmem [shape: bf16[1024,64], index: 3, kind: output, shape index: {0}]   ;;  %s2627_s4 = inlined_call_operand.hbm [shape: f32[4,1,64], index: 4, kind: output, shape index: {1}]   ;;  %s2628_s5 = inlined_call_operand.hbm [shape: f32[4,1,64], index: 5, kind: output, shape index: {2}]  }
   0x1   :  { %13 = vsyncpa [#allocation4 + $0x1], 0 }
   0x2   :  { %14 = vsyncpa [#allocation6], 0 }
   0x3   :  { %16 = vsyncpa [#allocation6 + $0x1], 0  ;;  %s1992_s18 = smov 0   ;;  %s1994_s19 = smov 0  }
   0x4   :  { %s1996_s20 = smov 0   ;;  %s1998_s21 = smov 0  }
   0x5   :  { %s2000_s22 = smov 0   ;;  %s2002_s23 = smov 0  }
   0x6 LB: > { %s1564_s24 = sadd.s32 4294967295, %s1955_s23   ;;  %s1565_s25 = sadd.s32 4294967294, %s1955_s23   ;;  %s1955_s23 = sphi %s2002_s23, %s22_s23   ;;  %s1951_s22 = sphi %s2000_s22, %s2635_s22   ;;  %s1947_s21 = sphi %s1998_s21, %s2634_s21   ;;  %s1943_s20 = sphi %s1996_s20, %s2633_s20   ;;  %s1939_s19 = sphi %s1994_s19, %s2632_s19   ;;  %s1935_s18 = sphi %s1992_s18, %s2631_s18  }
   0x7   : > { %s41_s26 = sadd.s32 1, %s1951_s22  ;;  %s160_s27 = sadd.s32 1, %s1943_s20 }
   0x8   : > { %p43_p0 = scmp.ge.s32.totalorder %s41_s26, 4  ;;  %p170_p1 = scmp.ne.s32.totalorder %s1943_s20, %s1939_s19 }
   0x9   : > { %p171_p2 = scmp.eq.s32.totalorder %s1564_s24, 3  ;;  %p176_p3 = scmp.ne.s32.totalorder %s1939_s19, %s1935_s18 }
   0xa   : > { %s2637_s26 = smov (%p43_p0, %s41_s26), 0  ;;  %p177_p5 = scmp.eq.s32.totalorder %s1565_s25, 3 }
   0xb   : > { %p2032_p4 = por %p171_p2, %p170_p1  ;;  %s155_s29 = ssub.s32 %s1951_s22, %s2637_s26 }
   0xc   : > { %p1570_p6 = scmp.ge.s32.totalorder %s1955_s23, 1  ;;  %p158_p7 = scmp.eq.s32.totalorder %s155_s29, 0 }
   0xd   : > { %p2039_p8 = por %p177_p5, %p176_p3  ;;  %p256_p9 = scmp.lt.s32.totalorder %s1955_s23, 5 }
   0xe   : > { %s2045_s6 = scalar_select %p158_p7, %s1943_s20, %s160_s27  }
   0xf   : > { %p257_p10 = pnand %p1570_p6, %p256_p9 }
  0x10   : > { %v1787_v0 = vld [vmem:[%s2624_s1] sm:$0xff] (!%p257_p10)   ;;  %v1957_v1 = vmov (!%p257_p10), 0   ;;  %v1788_v2 = vld [vmem:[%s2624_s1 + $0x8] sm:$0xff] (!%p257_p10)   ;;  %v1789_v3 = vld [vmem:[%s2624_s1 + $0x10] sm:$0xff] (!%p257_p10)   ;;  %s1571_s13 = sshll.u32 (!%p257_p10), %s1947_s21, 5  ;;  %vm349_vm0 = vcmask (!%p257_p10), 523264  }
  0x11   : > { %260 = sbr.rel (%p257_p10) target bundleno = 423 (0x1a7), region = 32  ;;  %722 = vmatprep.subr.bf16.mxu0 (!%p257_p10), %v1957_v1  ;;  %1704 = vmatprep.subr.bf16.mxu1 (!%p257_p10), %v1957_v1  ;;  %p313_p11 = scmp.lt.s32.totalorder (!%p257_p10), %s1571_s13, 127  ;;  %v1790_v4 = vld [vmem:[%s2624_s1 + $0x18] sm:$0xff] (!%p257_p10)   ;;  %v1958_v5 = vmov (!%p257_p10), 0.0   ;;  %v1791_v6 = vld [vmem:[%s2624_s1 + $0x20] sm:$0xff] (!%p257_p10)   ;;  %vm666_vm1 = vcmask (!%p257_p10), 154624  }
  0x12   : > { %723 = vmatpush1.bf16.msra.mxu0 (!%p257_p10), %v1787_v0  ;;  %1714 = vmatpush1.bf16.msra.mxu1 (!%p257_p10), %v1787_v0  ;;  %350 = vst.msk [vmem:[#allocation2] sm:$0xff] (!%p257_p10), %vm349_vm0, %v1958_v5  ;;  %351 = vst.msk [vmem:[#allocation2 + $0x8] sm:$0xff] (!%p257_p10), %vm349_vm0, %v1958_v5  ;;  %v1792_v8 = vld [vmem:[%s2624_s1 + $0x28] sm:$0xff] (!%p257_p10)   ;;  %v1793_v10 = vld [vmem:[%s2624_s1 + $0x30] sm:$0xff] (!%p257_p10)   ;;  %vm715_vm2 = vcmask (!%p257_p10), 1040384   ;;  %vm716_vm3 = vcmask (!%p257_p10), 1041408  }
  0x13   : > { %724 = vmatprep.subr.bf16.mxu0 (!%p257_p10), %v1957_v1  ;;  %1705 = vmatprep.subr.bf16.mxu1 (!%p257_p10), %v1957_v1  ;;  %352 = vst.msk [vmem:[#allocation2 + $0x10] sm:$0xff] (!%p257_p10), %vm349_vm0, %v1958_v5  ;;  %353 = vst.msk [vmem:[#allocation2 + $0x18] sm:$0xff] (!%p257_p10), %vm349_vm0, %v1958_v5  ;;  %v1794_v11 = vld [vmem:[%s2624_s1 + $0x38] sm:$0xff] (!%p257_p10)   ;;  %v1959_v12 = vmov (!%p257_p10), 65535   ;;  %v1795_v14 = vld [vmem:[%s2624_s1 + $0x40] sm:$0xff] (!%p257_p10)   ;;  %vm1323_vm4 = vcmask (!%p257_p10), 519168  }
  0x14   : > { %354 = vst.msk [vmem:[#allocation2 + $0x20] sm:$0xff] (!%p257_p10), %vm349_vm0, %v1958_v5  ;;  %355 = vst.msk [vmem:[#allocation2 + $0x28] sm:$0xff] (!%p257_p10), %vm349_vm0, %v1958_v5  ;;  %v717_v13 = vsel (!%p257_p10), %vm715_vm2, 4294967295, %v1959_v12  ;;  %v1796_v15 = vld [vmem:[%s2624_s1 + $0x48] ss:$0 sps:$4 sm:$0x33] (!%p257_p10)  }
  0x15   : > { %356 = vst.msk [vmem:[#allocation2 + $0x30] sm:$0xff] (!%p257_p10), %vm349_vm0, %v1958_v5  ;;  %357 = vst.msk [vmem:[#allocation2 + $0x38] sm:$0xff] (!%p257_p10), %vm349_vm0, %v1958_v5  ;;  %v718_v16 = vsel (!%p257_p10), %vm716_vm3, %v717_v13, 0  ;;  %s2532_s8 = sand.u32 (!%p257_p10), 1, %s1939_s19   ;;  %s1667_s9 = sshll.u32 (!%p257_p10), %s1947_s21, 4  ;;  %vm1091_vm5 = vcmask (!%p257_p10), 516096  }
  0x16   : > { %725 = vmatpush1.bf16.msra.mxu0 (!%p257_p10), %v1788_v2  ;;  %1715 = vmatpush1.bf16.msra.mxu1 (!%p257_p10), %v1788_v2  ;;  %358 = vst.msk [vmem:[#allocation2 + $0x40] sm:$0xff] (!%p257_p10), %vm349_vm0, %v1958_v5  ;;  %359 = vst.msk [vmem:[#allocation2 + $0x48] sm:$0xff] (!%p257_p10), %vm349_vm0, %v1958_v5  ;;  %v720_v17 = vand.u32 (!%p257_p10), %v1796_v15, %v718_v16  ;;  %v2195_v2 = vld [vmem:[%s2625_s2] ss:$0 sm:$0xff] (!%p257_p10)  ;;  %s304_s10 = scalar_lea.vmem (!%p257_p10), [#allocation3], %s2532_s8  ;;  %s310_s12 = scalar_lea.vmem (!%p257_p10), [#allocation5], %s2532_s8 }
  0x17   : > { %726 = vmatprep.subr.bf16.mxu0 (!%p257_p10), %v1957_v1  ;;  %1706 = vmatprep.subr.bf16.mxu1 (!%p257_p10), %v1957_v1  ;;  %360 = vst.msk [vmem:[#allocation2 + $0x50] sm:$0xff] (!%p257_p10), %vm349_vm0, %v1958_v5  ;;  %361 = vst.msk [vmem:[#allocation2 + $0x58] sm:$0xff] (!%p257_p10), %vm349_vm0, %v1958_v5  ;;  %s1386_s11 = sshll.u32 (!%p257_p10), %s304_s10, 4  ;;  %s1400_s14 = sshll.u32 (!%p257_p10), %s310_s12, 4  ;;  %s2544_s11 = int_to_ptr.vmem [resolvable:$true] %s1386_s11  ;;  %s2552_s14 = int_to_ptr.vmem [resolvable:$true] %s1400_s14 }
  0x18   : > { %s2639_s13 = smov (!%p313_p11, %s1571_s13), 127  ;;  %362 = vst.msk [vmem:[#allocation2 + $0x60] sm:$0xff] %vm349_vm0, %v1958_v5  ;;  %363 = vst.msk [vmem:[#allocation2 + $0x68] sm:$0xff] %vm349_vm0, %v1958_v5  ;;  %s2542_s17 = scalar_lea.hbm %s2627_s4, %s1667_s9 }
  0x19   : > { %s1671_s16 = sshll.u32 %s2639_s13, 3  ;;  %364 = vst.msk [vmem:[#allocation2 + $0x70] sm:$0xff] %vm349_vm0, %v1958_v5  ;;  %365 = vst.msk [vmem:[#allocation2 + $0x78] sm:$0xff] %vm349_vm0, %v1958_v5  ;;  %v382_v48 = vld [vmem:[#allocation2] sm:$0xff]  ;;  %v383_v51 = vld [vmem:[#allocation2 + $0x8] sm:$0xff]  ;;  %s1575_s27 = sshll.u32 %s2639_s13, 2 }
  0x1a   : > { %727 = vmatpush1.bf16.msra.mxu0 %v1789_v3  ;;  %1716 = vmatpush1.bf16.msra.mxu1 %v1789_v3  ;;  %366 = vst.msk [vmem:[#allocation2 + $0x80] sm:$0xff] %vm349_vm0, %v1958_v5  ;;  %367 = vst.msk [vmem:[#allocation2 + $0x88] sm:$0xff] %vm349_vm0, %v1958_v5  ;;  %s2108_s25 = scalar_lea.vmem %s2623_s0, %s1671_s16  ;;  %v384_v0 = vld [vmem:[#allocation2 + $0x10] sm:$0xff]  ;;  %s2209_s7 = scalar_lea.vmem %s2626_s3, %s1575_s27 }
  0x1b   : > { %728 = vmatprep.subr.bf16.mxu0 %v1957_v1  ;;  %1707 = vmatprep.subr.bf16.mxu1 %v1957_v1  ;;  %368 = vst.msk [vmem:[#allocation2 + $0x90] sm:$0xff] %vm349_vm0, %v1958_v5  ;;  %369 = vst.msk [vmem:[#allocation2 + $0x98] sm:$0xff] %vm349_vm0, %v1958_v5  ;;  %v1799_v7 = vld [vmem:[%s2108_s25 + $0x4] ss:$8 sps:$4 sm:$0xff]   ;;  %v1797_v18 = vld [vmem:[%s2108_s25] ss:$8 sps:$4 sm:$0xff]  }
  0x1c   : > { %370 = vst.msk [vmem:[#allocation2 + $0xa0] sm:$0xff] %vm349_vm0, %v1958_v5  ;;  %371 = vst.msk [vmem:[#allocation2 + $0xa8] sm:$0xff] %vm349_vm0, %v1958_v5  ;;  %1618 = vmatprep.mubr.msk.bf16.mxu0 %vm666_vm1, %v1799_v7  ;;  %v1811_v9 = vld [vmem:[%s2108_s25 + $0x84] ss:$8 sps:$4 sm:$0xff]   ;;  %v1809_v19 = vld [vmem:[%s2108_s25 + $0x80] ss:$8 sps:$4 sm:$0xff]  }
  0x1d   : > { %372 = vst.msk [vmem:[#allocation2 + $0xb0] sm:$0xff] %vm349_vm0, %v1958_v5  ;;  %373 = vst.msk [vmem:[#allocation2 + $0xb8] sm:$0xff] %vm349_vm0, %v1958_v5  ;;  %1626 = vmatprep.mubr.msk.bf16.mxu1 %vm666_vm1, %v1811_v9  ;;  %v1800_v20 = vld [vmem:[%s2108_s25 + $0x14] ss:$8 sps:$4 sm:$0xff]   ;;  %v1802_v22 = vld [vmem:[%s2108_s25 + $0x10] ss:$8 sps:$4 sm:$0xff]  }
  0x1e   : > { %374 = vst.msk [vmem:[#allocation2 + $0xc0] sm:$0xff] %vm349_vm0, %v1958_v5  ;;  %375 = vst.msk [vmem:[#allocation2 + $0xc8] sm:$0xff] %vm349_vm0, %v1958_v5  ;;  %729 = vmatpush1.bf16.msra.mxu0 %v1790_v4  ;;  %1717 = vmatpush1.bf16.msra.mxu1 %v1790_v4  ;;  %v1815_v21 = vld [vmem:[%s2108_s25 + $0x94] ss:$8 sps:$4 sm:$0xff]   ;;  %v1817_v23 = vld [vmem:[%s2108_s25 + $0x90] ss:$8 sps:$4 sm:$0xff]  }
  0x1f   : > { %376 = vst.msk [vmem:[#allocation2 + $0xd0] sm:$0xff] %vm349_vm0, %v1958_v5  ;;  %377 = vst.msk [vmem:[#allocation2 + $0xd8] sm:$0xff] %vm349_vm0, %v1958_v5  ;;  %730 = vmatprep.subr.bf16.mxu0 %v1957_v1  ;;  %1708 = vmatprep.subr.bf16.mxu1 %v1957_v1  ;;  %v1803_v24 = vld [vmem:[%s2108_s25 + $0x24] ss:$8 sps:$4 sm:$0xff]   ;;  %v1805_v26 = vld [vmem:[%s2108_s25 + $0x20] ss:$8 sps:$4 sm:$0xff]  }
  0x20   : > { %378 = vst.msk [vmem:[#allocation2 + $0xe0] sm:$0xff] %vm349_vm0, %v1958_v5  ;;  %379 = vst.msk [vmem:[#allocation2 + $0xe8] sm:$0xff] %vm349_vm0, %v1958_v5  ;;  %v1821_v25 = vld [vmem:[%s2108_s25 + $0xa4] ss:$8 sps:$4 sm:$0xff]   ;;  %v1823_v27 = vld [vmem:[%s2108_s25 + $0xa0] ss:$8 sps:$4 sm:$0xff]  }
  0x21   : > { %380 = vst.msk [vmem:[#allocation2 + $0xf0] sm:$0xff] %vm349_vm0, %v1958_v5  ;;  %381 = vst.msk [vmem:[#allocation2 + $0xf8] sm:$0xff] %vm349_vm0, %v1958_v5  ;;  %v1806_v28 = vld [vmem:[%s2108_s25 + $0x34] ss:$8 sps:$4 sm:$0xff]   ;;  %v1808_v30 = vld [vmem:[%s2108_s25 + $0x30] ss:$8 sps:$4 sm:$0xff]  }
  0x22   : > { %731 = vmatpush1.bf16.msra.mxu0 %v1791_v6  ;;  %1718 = vmatpush1.bf16.msra.mxu1 %v1791_v6  ;;  %v1827_v29 = vld [vmem:[%s2108_s25 + $0xb4] ss:$8 sps:$4 sm:$0xff]   ;;  %v1829_v31 = vld [vmem:[%s2108_s25 + $0xb0] ss:$8 sps:$4 sm:$0xff]   ;;  %v1812_v32 = vld [vmem:[%s2108_s25 + $0x44] ss:$8 sps:$4 sm:$0xff]  }
  0x23   : > { %732 = vmatprep.subr.bf16.mxu0 %v1957_v1  ;;  %1709 = vmatprep.subr.bf16.mxu1 %v1957_v1  ;;  %v1833_v33 = vld [vmem:[%s2108_s25 + $0xc4] ss:$8 sps:$4 sm:$0xff]   ;;  %v1814_v34 = vld [vmem:[%s2108_s25 + $0x40] ss:$8 sps:$4 sm:$0xff]   ;;  %v1818_v36 = vld [vmem:[%s2108_s25 + $0x54] ss:$8 sps:$4 sm:$0xff]  }
  0x24   : > { %v1835_v35 = vld [vmem:[%s2108_s25 + $0xc0] ss:$8 sps:$4 sm:$0xff]   ;;  %v1836_v37 = vld [vmem:[%s2108_s25 + $0xd4] ss:$8 sps:$4 sm:$0xff]   ;;  %v1820_v38 = vld [vmem:[%s2108_s25 + $0x50] ss:$8 sps:$4 sm:$0xff]  }
  0x25   : > { %v1838_v39 = vld [vmem:[%s2108_s25 + $0xd0] ss:$8 sps:$4 sm:$0xff]   ;;  %v1824_v40 = vld [vmem:[%s2108_s25 + $0x64] ss:$8 sps:$4 sm:$0xff]   ;;  %v1826_v42 = vld [vmem:[%s2108_s25 + $0x60] ss:$8 sps:$4 sm:$0xff]  }
  0x26   : > { %733 = vmatpush1.bf16.msra.mxu0 %v1792_v8  ;;  %1719 = vmatpush1.bf16.msra.mxu1 %v1792_v8  ;;  %v1839_v41 = vld [vmem:[%s2108_s25 + $0xe4] ss:$8 sps:$4 sm:$0xff]   ;;  %v1841_v43 = vld [vmem:[%s2108_s25 + $0xe0] ss:$8 sps:$4 sm:$0xff]   ;;  %v1830_v44 = vld [vmem:[%s2108_s25 + $0x74] ss:$8 sps:$4 sm:$0xff]  }
  0x27   : > { %734 = vmatprep.subr.bf16.mxu0 %v1957_v1  ;;  %1710 = vmatprep.subr.bf16.mxu1 %v1957_v1  ;;  %v1842_v45 = vld [vmem:[%s2108_s25 + $0xf4] ss:$8 sps:$4 sm:$0xff]   ;;  %v1832_v46 = vld [vmem:[%s2108_s25 + $0x70] ss:$8 sps:$4 sm:$0xff]   ;;  %v398_v49 = vld [vmem:[#allocation2 + $0x80] sm:$0xff]  ;;  %s1365_s27 = scalar_lea.sflag [#allocation4], %s2532_s8 }
  0x28   : > { %v1844_v47 = vld [vmem:[%s2108_s25 + $0xf0] ss:$8 sps:$4 sm:$0xff]   ;;  %v399_v53 = vld [vmem:[#allocation2 + $0x88] sm:$0xff]  ;;  %s2550_s25 = scalar_lea.hbm %s2628_s5, %s1667_s9  ;;  %s1845_s13 = scalar_lea.vmem %s2544_s11, 16 }
  0x29   : > { %v385_v4 = vld [vmem:[#allocation2 + $0x18] sm:$0xff]  ;;  %p1846_p12 = scmp.ne.s32.totalorder %s2544_s11, %s1845_s13  ;;  %s1960_s29 = smov [#allocation3]  }
  0x2a   : > { %735 = vmatpush1.bf16.msra.mxu0 %v1793_v10  ;;  %1720 = vmatpush1.bf16.msra.mxu1 %v1793_v10  ;;  %v401_v6 = vld [vmem:[#allocation2 + $0x98] sm:$0xff] }
  0x2b   : > { %736 = vmatprep.subr.bf16.mxu0 %v1957_v1  ;;  %1711 = vmatprep.subr.bf16.mxu1 %v1957_v1  ;;  %p1847_p13 = pnand %p1846_p12, %p2032_p4 }
  0x2d   : > { %p1848_p0 = pneg %p1847_p13 }
  0x2e   : > { %737 = vmatpush1.bf16.msra.mxu0 %v1794_v11  ;;  %1721 = vmatpush1.bf16.msra.mxu1 %v1794_v11 }
  0x2f   : > { %738 = vmatprep.subr.bf16.mxu0 %v1957_v1  ;;  %1712 = vmatprep.subr.bf16.mxu1 %v1957_v1 }
  0x32   : > { %739 = vmatpush1.bf16.msra.mxu0 %v1795_v14  ;;  %1722 = vmatpush1.bf16.msra.mxu1 %v1795_v14 }
  0x33   : > { %740 = vmatprep.subr.bf16.mxu0 %v1957_v1  ;;  %1713 = vmatprep.subr.bf16.mxu1 %v1957_v1  ;;  %v400_v1 = vld [vmem:[#allocation2 + $0x90] sm:$0xff] }
  0x36   : > { %741 = vmatpush1.bf16.msra.mxu0 %v720_v17  ;;  %1723 = vmatpush1.bf16.msra.mxu1 %v720_v17 }
  0x39   : > { %755 = vmatmul.mubr.bf16.vlgmr.msra.gmra.mrb[0].mxu0 %v1797_v18  ;;  %819 = vmatmul.mubr.bf16.vlgmr.msra.gmra.mrb[0].mxu1 %v1809_v19 }
  0x3a   : > { %1619 = vmatprep.mubr.msk.bf16.mxu0 %vm666_vm1, %v1800_v20  ;;  %1627 = vmatprep.mubr.msk.bf16.mxu1 %vm666_vm1, %v1815_v21 }
  0x41   : > { %763 = vmatmul.mubr.bf16.gmra.mrb[4].mxu0 %v1802_v22  ;;  %827 = vmatmul.mubr.bf16.gmra.mrb[4].mxu1 %v1817_v23 }
  0x42   : > { %1620 = vmatprep.mubr.msk.bf16.mxu0 %vm666_vm1, %v1803_v24  ;;  %1628 = vmatprep.mubr.msk.bf16.mxu1 %vm666_vm1, %v1821_v25  ;;  %v386_v25 = vld [vmem:[#allocation2 + $0x20] sm:$0xff] }
  0x49   : > { %771 = vmatmul.mubr.bf16.gmra.mrb[8].mxu0 %v1805_v26  ;;  %835 = vmatmul.mubr.bf16.gmra.mrb[8].mxu1 %v1823_v27 }
  0x4a   : > { %1621 = vmatprep.mubr.msk.bf16.mxu0 %vm666_vm1, %v1806_v28  ;;  %1629 = vmatprep.mubr.msk.bf16.mxu1 %vm666_vm1, %v1827_v29  ;;  %v402_v28 = vld [vmem:[#allocation2 + $0xa0] sm:$0xff] }
  0x51   : > { %779 = vmatmul.mubr.bf16.gmra.mrb[12].mxu0 %v1808_v30  ;;  %843 = vmatmul.mubr.bf16.gmra.mrb[12].mxu1 %v1829_v31  ;;  %v387_v31 = vld [vmem:[#allocation2 + $0x28] sm:$0xff] }
  0x52   : > { %1622 = vmatprep.mubr.msk.bf16.mxu0 %vm666_vm1, %v1812_v32  ;;  %1630 = vmatprep.mubr.msk.bf16.mxu1 %vm666_vm1, %v1833_v33 }
  0x59   : > { %787 = vmatmul.mubr.bf16.gmra.mrb[16].mxu0 %v1814_v34  ;;  %851 = vmatmul.mubr.bf16.gmra.mrb[16].mxu1 %v1835_v35  ;;  %v403_v34 = vld [vmem:[#allocation2 + $0xa8] sm:$0xff] }
  0x5a   : > { %1623 = vmatprep.mubr.msk.bf16.mxu0 %vm666_vm1, %v1818_v36  ;;  %1631 = vmatprep.mubr.msk.bf16.mxu1 %vm666_vm1, %v1836_v37 }
  0x61   : > { %795 = vmatmul.mubr.bf16.gmra.mrb[20].mxu0 %v1820_v38  ;;  %859 = vmatmul.mubr.bf16.gmra.mrb[20].mxu1 %v1838_v39 }
  0x62   : > { %1624 = vmatprep.mubr.msk.bf16.mxu0 %vm666_vm1, %v1824_v40  ;;  %1632 = vmatprep.mubr.msk.bf16.mxu1 %vm666_vm1, %v1839_v41 }
  0x69   : > { %803 = vmatmul.mubr.bf16.gmra.mrb[24].mxu0 %v1826_v42  ;;  %867 = vmatmul.mubr.bf16.gmra.mrb[24].mxu1 %v1841_v43 }
  0x6a   : > { %1625 = vmatprep.mubr.msk.bf16.mxu0 %vm666_vm1, %v1830_v44  ;;  %1633 = vmatprep.mubr.msk.bf16.mxu1 %vm666_vm1, %v1842_v45 }
  0x71   : > { %811 = vmatmul.mubr.bf16.gmra.mrb[28].mxu0 %v1832_v46  ;;  %875 = vmatmul.mubr.bf16.gmra.mrb[28].mxu1 %v1844_v47 }
 0x10c   : > { %v756_v50 = vpop.f32.mrb[0].mxu0  ;;  %v820_v52 = vpop.f32.mrb[0].mxu1 }
 0x10d   : > { %v883_v54 = vadd.f32 %v756_v50, %v382_v48  ;;  %v758_v55 = vpop.f32.mrb[1].mxu0  ;;  %v899_v56 = vadd.f32 %v820_v52, %v398_v49  ;;  %v822_v57 = vpop.f32.mrb[1].mxu1 }
 0x10e   : > { %v759_v58 = vpop.f32.mrb[2].mxu0  ;;  %v823_v59 = vpop.f32.mrb[2].mxu1 }
 0x10f   : > { %916 = vst.msk [vmem:[#allocation2] sm:$0xff] %vm349_vm0, %v883_v54  ;;  %v884_v60 = vadd.f32 %v759_v58, %v383_v51  ;;  %v761_v61 = vpop.f32.mrb[3].mxu0  ;;  %932 = vst.msk [vmem:[#allocation2 + $0x80] sm:$0xff] %vm349_vm0, %v899_v56  ;;  %v900_v62 = vadd.f32 %v823_v59, %v399_v53  ;;  %v825_v63 = vpop.f32.mrb[3].mxu1  ;;  %v388_v53 = vld [vmem:[#allocation2 + $0x30] sm:$0xff]  ;;  %v389_v59 = vld [vmem:[#allocation2 + $0x38] sm:$0xff] }
 0x110   : > { %v404_v56 = vld [vmem:[#allocation2 + $0xb0] sm:$0xff] }
 0x111   : > { %917 = vst.msk [vmem:[#allocation2 + $0x8] sm:$0xff] %vm349_vm0, %v884_v60  ;;  %933 = vst.msk [vmem:[#allocation2 + $0x88] sm:$0xff] %vm349_vm0, %v900_v62  ;;  %v405_v62 = vld [vmem:[#allocation2 + $0xb8] sm:$0xff] }
 0x114   : > { %v764_v3 = vpop.f32.mrb[4].mxu0  ;;  %v828_v5 = vpop.f32.mrb[4].mxu1 }
 0x115   : > { %v885_v7 = vadd.f32 %v764_v3, %v384_v0  ;;  %v766_v8 = vpop.f32.mrb[5].mxu0  ;;  %v901_v9 = vadd.f32 %v828_v5, %v400_v1  ;;  %v830_v10 = vpop.f32.mrb[5].mxu1 }
 0x116   : > { %v951_v11 = vld [vmem:[#allocation2] sm:$0xff]  ;;  %v767_v12 = vpop.f32.mrb[6].mxu0  ;;  %v831_v14 = vpop.f32.mrb[6].mxu1 }
 0x117   : > { %v967_v13 = vld [vmem:[#allocation2 + $0x80] sm:$0xff]  ;;  %v2199_v15 = vadd.f32 %v2195_v2, %v951_v11  ;;  %918 = vst.msk [vmem:[#allocation2 + $0x10] sm:$0xff] %vm349_vm0, %v885_v7  ;;  %v886_v16 = vadd.f32 %v767_v12, %v385_v4  ;;  %v769_v17 = vpop.f32.mrb[7].mxu0  ;;  %934 = vst.msk [vmem:[#allocation2 + $0x90] sm:$0xff] %vm349_vm0, %v901_v9  ;;  %v902_v19 = vadd.f32 %v831_v14, %v401_v6  ;;  %v833_v20 = vpop.f32.mrb[7].mxu1 }
 0x118   : > { %v2203_v18 = vadd.f32 %v2195_v2, %v967_v13  ;;  %v952_v21 = vld [vmem:[#allocation2 + $0x8] sm:$0xff] }
 0x119   : > { %v968_v22 = vld [vmem:[#allocation2 + $0x88] sm:$0xff]  ;;  %v1672_v23 = vpack.c.bf16 %v2199_v15, %v2199_v15  ;;  %v2214_v24 = vadd.f32 %v2195_v2, %v952_v21  ;;  %919 = vst.msk [vmem:[#allocation2 + $0x18] sm:$0xff] %vm349_vm0, %v886_v16  ;;  %935 = vst.msk [vmem:[#allocation2 + $0x98] sm:$0xff] %vm349_vm0, %v902_v19  ;;  %v1093_v5 = vmul.f32 %v2199_v15, %v2199_v15 }
 0x11a   : > { %v1688_v26 = vpack.c.bf16 %v2203_v18, %v2203_v18  ;;  %v2221_v27 = vadd.f32 %v2195_v2, %v968_v22 }
 0x11b   : > { %1324 = vst.msk [vmem:[%s2209_s7] sm:$0xf] %vm1323_vm4, %v1672_v23  ;;  %v1673_v29 = vpack.c.bf16 %v2214_v24, %v2214_v24  ;;  %v1094_v63 = vmul.f32 %v2214_v24, %v2214_v24  ;;  %v1023_v21 = vsel %vm349_vm0, %v2214_v24, 0.0 }
 0x11c   : > { %v772_v30 = vpop.f32.mrb[8].mxu0  ;;  %1340 = vst.msk [vmem:[%s2209_s7 + $0x40] sm:$0xf] %vm1323_vm4, %v1688_v26  ;;  %v1689_v32 = vpack.c.bf16 %v2221_v27, %v2221_v27  ;;  %v836_v33 = vpop.f32.mrb[8].mxu1  ;;  %v1022_v26 = vsel %vm349_vm0, %v2199_v15, 0.0 }
 0x11d   : > { %1325 = vst.msk [vmem:[%s2209_s7 + $0x4] sm:$0xf] %vm1323_vm4, %v1673_v29  ;;  %v887_v35 = vadd.f32 %v772_v30, %v386_v25  ;;  %v774_v36 = vpop.f32.mrb[9].mxu0  ;;  %v903_v37 = vadd.f32 %v836_v33, %v402_v28  ;;  %v838_v38 = vpop.f32.mrb[9].mxu1  ;;  %v1126_v22 = vsel %vm349_vm0, %v1094_v63, 0.0  ;;  %v390_v29 = vld [vmem:[#allocation2 + $0x40] sm:$0xff] }
 0x11e   : > { %v953_v39 = vld [vmem:[#allocation2 + $0x10] sm:$0xff]  ;;  %v775_v40 = vpop.f32.mrb[10].mxu0  ;;  %1341 = vst.msk [vmem:[%s2209_s7 + $0x44] sm:$0xf] %vm1323_vm4, %v1689_v32  ;;  %v839_v42 = vpop.f32.mrb[10].mxu1  ;;  %v1125_v32 = vsel %vm349_vm0, %v1093_v5, 0.0 }
 0x11f   : > { %v969_v41 = vld [vmem:[#allocation2 + $0x90] sm:$0xff]  ;;  %v992_v43 = vadd.f32 %v2195_v2, %v953_v39  ;;  %920 = vst.msk [vmem:[#allocation2 + $0x20] sm:$0xff] %vm349_vm0, %v887_v35  ;;  %v888_v44 = vadd.f32 %v775_v40, %v387_v31  ;;  %v777_v45 = vpop.f32.mrb[11].mxu0  ;;  %936 = vst.msk [vmem:[#allocation2 + $0xa0] sm:$0xff] %vm349_vm0, %v903_v37  ;;  %v904_v47 = vadd.f32 %v839_v42, %v403_v34  ;;  %v841_v48 = vpop.f32.mrb[11].mxu1  ;;  %v406_v31 = vld [vmem:[#allocation2 + $0xc0] sm:$0xff] }
 0x120   : > { %v2238_v46 = vadd.f32 %v2195_v2, %v969_v41  ;;  %v954_v49 = vld [vmem:[#allocation2 + $0x18] sm:$0xff]  ;;  %v1024_v35 = vadd.f32 %v1023_v21, %v1022_v26  ;;  %v1127_v36 = vadd.f32 %v1126_v22, %v1125_v32  ;;  %v391_v38 = vld [vmem:[#allocation2 + $0x48] sm:$0xff] }
 0x121   : > { %v970_v50 = vld [vmem:[#allocation2 + $0x98] sm:$0xff]  ;;  %v1674_v51 = vpack.c.bf16 %v992_v43, %v992_v43  ;;  %v2242_v52 = vadd.f32 %v2195_v2, %v954_v49  ;;  %921 = vst.msk [vmem:[#allocation2 + $0x28] sm:$0xff] %vm349_vm0, %v888_v44  ;;  %937 = vst.msk [vmem:[#allocation2 + $0xa8] sm:$0xff] %vm349_vm0, %v904_v47  ;;  %v1095_v6 = vmul.f32 %v992_v43, %v992_v43  ;;  %v1025_v33 = vsel %vm349_vm0, %v992_v43, 0.0  ;;  %v407_v41 = vld [vmem:[#allocation2 + $0xc8] sm:$0xff] }
 0x122   : > { %v1690_v54 = vpack.c.bf16 %v2238_v46, %v2238_v46  ;;  %v2249_v55 = vadd.f32 %v2195_v2, %v970_v50  ;;  %v1026_v48 = vadd.f32 %v1025_v33, %v1024_v35  ;;  %v393_v21 = vld [vmem:[#allocation2 + $0x58] sm:$0xff] }
 0x123   : > { %1326 = vst.msk [vmem:[%s2209_s7 + $0x8] sm:$0xf] %vm1323_vm4, %v1674_v51  ;;  %v1675_v57 = vpack.c.bf16 %v2242_v52, %v2242_v52  ;;  %v1096_v28 = vmul.f32 %v2242_v52, %v2242_v52  ;;  %v1128_v34 = vsel %vm349_vm0, %v1095_v6, 0.0  ;;  %v1027_v50 = vsel %vm349_vm0, %v2242_v52, 0.0 }
 0x124   : > { %v780_v58 = vpop.f32.mrb[12].mxu0  ;;  %1342 = vst.msk [vmem:[%s2209_s7 + $0x48] sm:$0xf] %vm1323_vm4, %v1690_v54  ;;  %v1691_v60 = vpack.c.bf16 %v2249_v55, %v2249_v55  ;;  %v844_v61 = vpop.f32.mrb[12].mxu1  ;;  %v1129_v49 = vadd.f32 %v1128_v34, %v1127_v36 }
 0x125   : > { %1327 = vst.msk [vmem:[%s2209_s7 + $0xc] sm:$0xf] %vm1323_vm4, %v1675_v57  ;;  %v889_v0 = vadd.f32 %v780_v58, %v388_v53  ;;  %v782_v1 = vpop.f32.mrb[13].mxu0  ;;  %v905_v3 = vadd.f32 %v844_v61, %v404_v56  ;;  %v846_v4 = vpop.f32.mrb[13].mxu1  ;;  %v1130_v51 = vsel %vm349_vm0, %v1096_v28, 0.0 }
 0x126   : > { %v955_v7 = vld [vmem:[#allocation2 + $0x20] sm:$0xff]  ;;  %v783_v8 = vpop.f32.mrb[14].mxu0  ;;  %1343 = vst.msk [vmem:[%s2209_s7 + $0x4c] sm:$0xf] %vm1323_vm4, %v1691_v60  ;;  %v847_v10 = vpop.f32.mrb[14].mxu1 }
 0x127   : > { %v971_v9 = vld [vmem:[#allocation2 + $0xa0] sm:$0xff]  ;;  %v994_v11 = vadd.f32 %v2195_v2, %v955_v7  ;;  %922 = vst.msk [vmem:[#allocation2 + $0x30] sm:$0xff] %vm349_vm0, %v889_v0  ;;  %v890_v12 = vadd.f32 %v783_v8, %v389_v59  ;;  %v785_v13 = vpop.f32.mrb[15].mxu0  ;;  %938 = vst.msk [vmem:[#allocation2 + $0xb0] sm:$0xff] %vm349_vm0, %v905_v3  ;;  %v906_v16 = vadd.f32 %v847_v10, %v405_v62  ;;  %v849_v17 = vpop.f32.mrb[15].mxu1  ;;  %v408_v10 = vld [vmem:[#allocation2 + $0xd0] sm:$0xff] }
 0x128   : > { %v2270_v14 = vadd.f32 %v2195_v2, %v971_v9  ;;  %v956_v19 = vld [vmem:[#allocation2 + $0x28] sm:$0xff]  ;;  %v1028_v7 = vadd.f32 %v1027_v50, %v1026_v48  ;;  %v1131_v8 = vadd.f32 %v1130_v51, %v1129_v49  ;;  %v392_v9 = vld [vmem:[#allocation2 + $0x50] sm:$0xff] }
 0x129   : > { %v972_v20 = vld [vmem:[#allocation2 + $0xa8] sm:$0xff]  ;;  %v1676_v23 = vpack.c.bf16 %v994_v11, %v994_v11  ;;  %v2277_v25 = vadd.f32 %v2195_v2, %v956_v19  ;;  %923 = vst.msk [vmem:[#allocation2 + $0x38] sm:$0xff] %vm349_vm0, %v890_v12  ;;  %939 = vst.msk [vmem:[#allocation2 + $0xb8] sm:$0xff] %vm349_vm0, %v906_v16  ;;  %v1097_v42 = vmul.f32 %v994_v11, %v994_v11  ;;  %v1029_v63 = vsel %vm349_vm0, %v994_v11, 0.0 }
 0x12a   : > { %v1692_v24 = vpack.c.bf16 %v2270_v14, %v2270_v14  ;;  %v2288_v30 = vadd.f32 %v2195_v2, %v972_v20  ;;  %v1030_v16 = vadd.f32 %v1029_v63, %v1028_v7 }
 0x12b   : > { %1328 = vst.msk [vmem:[%s2209_s7 + $0x10] sm:$0xf] %vm1323_vm4, %v1676_v23  ;;  %v1677_v15 = vpack.c.bf16 %v2277_v25, %v2277_v25  ;;  %v1132_v3 = vsel %vm349_vm0, %v1097_v42, 0.0  ;;  %v1098_v4 = vmul.f32 %v2277_v25, %v2277_v25  ;;  %v1031_v19 = vsel %vm349_vm0, %v2277_v25, 0.0  ;;  %v409_v23 = vld [vmem:[#allocation2 + $0xd8] sm:$0xff] }
 0x12c   : > { %v788_v37 = vpop.f32.mrb[16].mxu0  ;;  %1344 = vst.msk [vmem:[%s2209_s7 + $0x50] sm:$0xf] %vm1323_vm4, %v1692_v24  ;;  %v1693_v39 = vpack.c.bf16 %v2288_v30, %v2288_v30  ;;  %v852_v40 = vpop.f32.mrb[16].mxu1  ;;  %v1133_v17 = vadd.f32 %v1132_v3, %v1131_v8  ;;  %v411_v3 = vld [vmem:[#allocation2 + $0xe8] sm:$0xff] }
 0x12d   : > { %1329 = vst.msk [vmem:[%s2209_s7 + $0x14] sm:$0xf] %vm1323_vm4, %v1677_v15  ;;  %v891_v43 = vadd.f32 %v788_v37, %v390_v29  ;;  %v790_v44 = vpop.f32.mrb[17].mxu0  ;;  %v907_v45 = vadd.f32 %v852_v40, %v406_v31  ;;  %v854_v47 = vpop.f32.mrb[17].mxu1  ;;  %v1134_v28 = vsel %vm349_vm0, %v1098_v4, 0.0 }
 0x12e   : > { %v957_v53 = vld [vmem:[#allocation2 + $0x30] sm:$0xff]  ;;  %v791_v54 = vpop.f32.mrb[18].mxu0  ;;  %1345 = vst.msk [vmem:[%s2209_s7 + $0x54] sm:$0xf] %vm1323_vm4, %v1693_v39  ;;  %v855_v57 = vpop.f32.mrb[18].mxu1  ;;  %v1135_v44 = vadd.f32 %v1134_v28, %v1133_v17 }
 0x12f   : > { %v973_v56 = vld [vmem:[#allocation2 + $0xb0] sm:$0xff]  ;;  %v996_v58 = vadd.f32 %v2195_v2, %v957_v53  ;;  %924 = vst.msk [vmem:[#allocation2 + $0x40] sm:$0xff] %vm349_vm0, %v891_v43  ;;  %v892_v59 = vadd.f32 %v791_v54, %v391_v38  ;;  %v793_v60 = vpop.f32.mrb[19].mxu0  ;;  %940 = vst.msk [vmem:[#allocation2 + $0xc0] sm:$0xff] %vm349_vm0, %v907_v45  ;;  %v908_v61 = vadd.f32 %v855_v57, %v407_v41  ;;  %v857_v62 = vpop.f32.mrb[19].mxu1  ;;  %v410_v57 = vld [vmem:[#allocation2 + $0xe0] sm:$0xff] }
 0x130   : > { %v2312_v52 = vadd.f32 %v2195_v2, %v973_v56  ;;  %v958_v0 = vld [vmem:[#allocation2 + $0x38] sm:$0xff]  ;;  %v1032_v43 = vadd.f32 %v1031_v19, %v1030_v16  ;;  %v394_v56 = vld [vmem:[#allocation2 + $0x60] sm:$0xff] }
 0x131   : > { %v974_v1 = vld [vmem:[#allocation2 + $0xb8] sm:$0xff]  ;;  %v1678_v5 = vpack.c.bf16 %v996_v58, %v996_v58  ;;  %v997_v6 = vadd.f32 %v2195_v2, %v958_v0  ;;  %925 = vst.msk [vmem:[#allocation2 + $0x48] sm:$0xff] %vm349_vm0, %v892_v59  ;;  %941 = vst.msk [vmem:[#allocation2 + $0xc8] sm:$0xff] %vm349_vm0, %v908_v61  ;;  %v1099_v29 = vmul.f32 %v996_v58, %v996_v58  ;;  %v1033_v25 = vsel %vm349_vm0, %v996_v58, 0.0  ;;  %v395_v0 = vld [vmem:[#allocation2 + $0x68] sm:$0xff] }
 0x132   : > { %v2322_v11 = vadd.f32 %v2195_v2, %v974_v1  ;;  %v1694_v12 = vpack.c.bf16 %v2312_v52, %v2312_v52  ;;  %v1034_v53 = vadd.f32 %v1033_v25, %v1032_v43 }
 0x133   : > { %1330 = vst.msk [vmem:[%s2209_s7 + $0x18] sm:$0xf] %vm1323_vm4, %v1678_v5  ;;  %v1679_v13 = vpack.c.bf16 %v997_v6, %v997_v6  ;;  %v1136_v48 = vsel %vm349_vm0, %v1099_v29, 0.0  ;;  %v1100_v49 = vmul.f32 %v997_v6, %v997_v6  ;;  %v1035_v60 = vsel %vm349_vm0, %v997_v6, 0.0 }
 0x134   : > { %v796_v20 = vpop.f32.mrb[20].mxu0  ;;  %v860_v22 = vpop.f32.mrb[20].mxu1  ;;  %v1695_v26 = vpack.c.bf16 %v2322_v11, %v2322_v11  ;;  %1346 = vst.msk [vmem:[%s2209_s7 + $0x58] sm:$0xf] %vm1323_vm4, %v1694_v12  ;;  %v1137_v62 = vadd.f32 %v1136_v48, %v1135_v44  ;;  %v1036_v12 = vadd.f32 %v1035_v60, %v1034_v53  ;;  %v413_v53 = vld [vmem:[#allocation2 + $0xf8] sm:$0xff] }
 0x135   : > { %1331 = vst.msk [vmem:[%s2209_s7 + $0x1c] sm:$0xf] %vm1323_vm4, %v1679_v13  ;;  %v893_v24 = vadd.f32 %v796_v20, %v392_v9  ;;  %v798_v31 = vpop.f32.mrb[21].mxu0  ;;  %v909_v32 = vadd.f32 %v860_v22, %v408_v10  ;;  %v862_v33 = vpop.f32.mrb[21].mxu1  ;;  %v1138_v5 = vsel %vm349_vm0, %v1100_v49, 0.0 }
 0x136   : > { %v959_v34 = vld [vmem:[#allocation2 + $0x40] sm:$0xff]  ;;  %v799_v15 = vpop.f32.mrb[22].mxu0  ;;  %v863_v35 = vpop.f32.mrb[22].mxu1  ;;  %1347 = vst.msk [vmem:[%s2209_s7 + $0x5c] sm:$0xf] %vm1323_vm4, %v1695_v26  ;;  %v1139_v31 = vadd.f32 %v1138_v5, %v1137_v62 }
 0x137   : > { %v975_v36 = vld [vmem:[#allocation2 + $0xc0] sm:$0xff]  ;;  %v998_v37 = vadd.f32 %v2195_v2, %v959_v34  ;;  %926 = vst.msk [vmem:[#allocation2 + $0x50] sm:$0xff] %vm349_vm0, %v893_v24  ;;  %v894_v38 = vadd.f32 %v799_v15, %v393_v21  ;;  %v801_v39 = vpop.f32.mrb[23].mxu0  ;;  %942 = vst.msk [vmem:[#allocation2 + $0xd0] sm:$0xff] %vm349_vm0, %v909_v32  ;;  %v910_v40 = vadd.f32 %v863_v35, %v409_v23  ;;  %v865_v41 = vpop.f32.mrb[23].mxu1 }
 0x138   : > { %v2344_v42 = vadd.f32 %v2195_v2, %v975_v36  ;;  %v960_v45 = vld [vmem:[#allocation2 + $0x48] sm:$0xff]  ;;  %v412_v39 = vld [vmem:[#allocation2 + $0xf0] sm:$0xff] }
 0x139   : > { %v976_v47 = vld [vmem:[#allocation2 + $0xc8] sm:$0xff]  ;;  %v1680_v50 = vpack.c.bf16 %v998_v37, %v998_v37  ;;  %v999_v51 = vadd.f32 %v2195_v2, %v960_v45  ;;  %927 = vst.msk [vmem:[#allocation2 + $0x58] sm:$0xff] %vm349_vm0, %v894_v38  ;;  %943 = vst.msk [vmem:[#allocation2 + $0xd8] sm:$0xff] %vm349_vm0, %v910_v40  ;;  %v1101_v54 = vmul.f32 %v998_v37, %v998_v37  ;;  %v1037_v7 = vsel %vm349_vm0, %v998_v37, 0.0  ;;  %v396_v38 = vld [vmem:[#allocation2 + $0x70] sm:$0xff] }
 0x13a   : > { %v2351_v58 = vadd.f32 %v2195_v2, %v976_v47  ;;  %v1696_v59 = vpack.c.bf16 %v2344_v42, %v2344_v42  ;;  %v1038_v32 = vadd.f32 %v1037_v7, %v1036_v12 }
 0x13b   : > { %1332 = vst.msk [vmem:[%s2209_s7 + $0x20] sm:$0xf] %vm1323_vm4, %v1680_v50  ;;  %v1681_v61 = vpack.c.bf16 %v999_v51, %v999_v51  ;;  %v1140_v13 = vsel %vm349_vm0, %v1101_v54, 0.0  ;;  %v1102_v16 = vmul.f32 %v999_v51, %v999_v51  ;;  %v1039_v34 = vsel %vm349_vm0, %v999_v51, 0.0  ;;  %v397_v50 = vld [vmem:[#allocation2 + $0x78] sm:$0xff] }
 0x13c   : > { %v804_v63 = vpop.f32.mrb[24].mxu0  ;;  %v868_v1 = vpop.f32.mrb[24].mxu1  ;;  %v1697_v4 = vpack.c.bf16 %v2351_v58, %v2351_v58  ;;  %1348 = vst.msk [vmem:[%s2209_s7 + $0x60] sm:$0xf] %vm1323_vm4, %v1696_v59  ;;  %v1141_v37 = vadd.f32 %v1140_v13, %v1139_v31  ;;  %v1040_v47 = vadd.f32 %v1039_v34, %v1038_v32 }
 0x13d   : > { %1333 = vst.msk [vmem:[%s2209_s7 + $0x24] sm:$0xf] %vm1323_vm4, %v1681_v61  ;;  %v895_v6 = vadd.f32 %v804_v63, %v394_v56  ;;  %v806_v8 = vpop.f32.mrb[25].mxu0  ;;  %v911_v9 = vadd.f32 %v868_v1, %v410_v57  ;;  %v870_v10 = vpop.f32.mrb[25].mxu1  ;;  %v1142_v43 = vsel %vm349_vm0, %v1102_v16, 0.0 }
 0x13e   : > { %v961_v17 = vld [vmem:[#allocation2 + $0x50] sm:$0xff]  ;;  %v807_v19 = vpop.f32.mrb[26].mxu0  ;;  %v871_v20 = vpop.f32.mrb[26].mxu1  ;;  %1349 = vst.msk [vmem:[%s2209_s7 + $0x64] sm:$0xf] %vm1323_vm4, %v1697_v4  ;;  %v1143_v62 = vadd.f32 %v1142_v43, %v1141_v37 }
 0x13f   : > { %v977_v21 = vld [vmem:[#allocation2 + $0xd0] sm:$0xff]  ;;  %v1000_v22 = vadd.f32 %v2195_v2, %v961_v17  ;;  %928 = vst.msk [vmem:[#allocation2 + $0x60] sm:$0xff] %vm349_vm0, %v895_v6  ;;  %v896_v23 = vadd.f32 %v807_v19, %v395_v0  ;;  %v809_v26 = vpop.f32.mrb[27].mxu0  ;;  %944 = vst.msk [vmem:[#allocation2 + $0xe0] sm:$0xff] %vm349_vm0, %v911_v9  ;;  %v912_v28 = vadd.f32 %v871_v20, %v411_v3  ;;  %v873_v29 = vpop.f32.mrb[27].mxu1 }
 0x140   : > { %v2373_v24 = vadd.f32 %v2195_v2, %v977_v21  ;;  %v962_v33 = vld [vmem:[#allocation2 + $0x58] sm:$0xff] }
 0x141   : > { %v978_v25 = vld [vmem:[#allocation2 + $0xd8] sm:$0xff]  ;;  %v1103_v15 = vmul.f32 %v1000_v22, %v1000_v22  ;;  %v1682_v35 = vpack.c.bf16 %v1000_v22, %v1000_v22  ;;  %v1001_v36 = vadd.f32 %v2195_v2, %v962_v33  ;;  %929 = vst.msk [vmem:[#allocation2 + $0x68] sm:$0xff] %vm349_vm0, %v896_v23  ;;  %945 = vst.msk [vmem:[#allocation2 + $0xe8] sm:$0xff] %vm349_vm0, %v912_v28  ;;  %v1041_v44 = vsel %vm349_vm0, %v1000_v22, 0.0 }
 0x142   : > { %v2380_v40 = vadd.f32 %v2195_v2, %v978_v25  ;;  %v1698_v41 = vpack.c.bf16 %v2373_v24, %v2373_v24  ;;  %v1042_v63 = vadd.f32 %v1041_v44, %v1040_v47  ;;  %v1109_v44 = vmul.f32 %v2203_v18, %v2203_v18 }
 0x143   : > { %1334 = vst.msk [vmem:[%s2209_s7 + $0x28] sm:$0xf] %vm1323_vm4, %v1682_v35  ;;  %v1683_v45 = vpack.c.bf16 %v1001_v36, %v1001_v36  ;;  %v1104_v48 = vmul.f32 %v1001_v36, %v1001_v36  ;;  %v1144_v56 = vsel %vm349_vm0, %v1103_v15, 0.0  ;;  %v1043_v0 = vsel %vm349_vm0, %v1001_v36, 0.0 }
 0x144   : > { %v812_v49 = vpop.f32.mrb[28].mxu0  ;;  %v876_v51 = vpop.f32.mrb[28].mxu1  ;;  %v1699_v54 = vpack.c.bf16 %v2380_v40, %v2380_v40  ;;  %1350 = vst.msk [vmem:[%s2209_s7 + $0x68] sm:$0xf] %vm1323_vm4, %v1698_v41  ;;  %v1145_v13 = vadd.f32 %v1144_v56, %v1143_v62  ;;  %v1044_v26 = vadd.f32 %v1043_v0, %v1042_v63 }
 0x145   : > { %1335 = vst.msk [vmem:[%s2209_s7 + $0x2c] sm:$0xf] %vm1323_vm4, %v1683_v45  ;;  %v897_v57 = vadd.f32 %v812_v49, %v396_v38  ;;  %v814_v59 = vpop.f32.mrb[29].mxu0  ;;  %v913_v60 = vadd.f32 %v876_v51, %v412_v39  ;;  %v878_v61 = vpop.f32.mrb[29].mxu1  ;;  %v1146_v16 = vsel %vm349_vm0, %v1104_v48, 0.0 }
 0x146   : > { %v963_v1 = vld [vmem:[#allocation2 + $0x60] sm:$0xff]  ;;  %v815_v3 = vpop.f32.mrb[30].mxu0  ;;  %v879_v4 = vpop.f32.mrb[30].mxu1  ;;  %1351 = vst.msk [vmem:[%s2209_s7 + $0x6c] sm:$0xf] %vm1323_vm4, %v1699_v54  ;;  %v1147_v25 = vadd.f32 %v1146_v16, %v1145_v13  ;;  %v1057_v16 = vsel %vm349_vm0, %v2238_v46, 0.0 }
 0x147   : > { %v979_v5 = vld [vmem:[#allocation2 + $0xe0] sm:$0xff]  ;;  %v1002_v7 = vadd.f32 %v2195_v2, %v963_v1  ;;  %930 = vst.msk [vmem:[#allocation2 + $0x70] sm:$0xff] %vm349_vm0, %v897_v57  ;;  %v898_v6 = vadd.f32 %v815_v3, %v397_v50  ;;  %v817_v8 = vpop.f32.mrb[31].mxu0  ;;  %946 = vst.msk [vmem:[#allocation2 + $0xf0] sm:$0xff] %vm349_vm0, %v913_v60  ;;  %v914_v9 = vadd.f32 %v879_v4, %v413_v53  ;;  %v881_v10 = vpop.f32.mrb[31].mxu1 }
 0x148   : > { %v2402_v12 = vadd.f32 %v2195_v2, %v979_v5  ;;  %v964_v17 = vld [vmem:[#allocation2 + $0x68] sm:$0xff]  ;;  %v1110_v4 = vmul.f32 %v2221_v27, %v2221_v27  ;;  %v1055_v8 = vsel %vm349_vm0, %v2221_v27, 0.0  ;;  %v1156_v10 = vsel %vm349_vm0, %v1109_v44, 0.0 }
 0x149   : > { %v980_v19 = vld [vmem:[#allocation2 + $0xe8] sm:$0xff]  ;;  %v1045_v20 = vsel %vm349_vm0, %v1002_v7, 0.0  ;;  %v1105_v21 = vmul.f32 %v1002_v7, %v1002_v7  ;;  %v1684_v22 = vpack.c.bf16 %v1002_v7, %v1002_v7  ;;  %v1003_v23 = vadd.f32 %v2195_v2, %v964_v17  ;;  %931 = vst.msk [vmem:[#allocation2 + $0x78] sm:$0xff] %vm349_vm0, %v898_v6  ;;  %947 = vst.msk [vmem:[#allocation2 + $0xf8] sm:$0xff] %vm349_vm0, %v914_v9 }
 0x14a   : > { %v2410_v28 = vadd.f32 %v2195_v2, %v980_v19  ;;  %v1700_v29 = vpack.c.bf16 %v2402_v12, %v2402_v12  ;;  %v1046_v34 = vadd.f32 %v1045_v20, %v1044_v26  ;;  %v1111_v9 = vmul.f32 %v2238_v46, %v2238_v46 }
 0x14b   : > { %v1148_v31 = vsel %vm349_vm0, %v1105_v21, 0.0  ;;  %1336 = vst.msk [vmem:[%s2209_s7 + $0x30] sm:$0xf] %vm1323_vm4, %v1684_v22  ;;  %v1106_v32 = vmul.f32 %v1003_v23, %v1003_v23  ;;  %v1685_v33 = vpack.c.bf16 %v1003_v23, %v1003_v23  ;;  %v1047_v35 = vsel %vm349_vm0, %v1003_v23, 0.0 }
 0x14c   : > { %v1701_v15 = vpack.c.bf16 %v2410_v28, %v2410_v28  ;;  %1352 = vst.msk [vmem:[%s2209_s7 + $0x70] sm:$0xf] %vm1323_vm4, %v1700_v29  ;;  %v1149_v36 = vadd.f32 %v1148_v31, %v1147_v25  ;;  %v1048_v45 = vadd.f32 %v1047_v35, %v1046_v34  ;;  %v1112_v17 = vmul.f32 %v2249_v55, %v2249_v55 }
 0x14d   : > { %1337 = vst.msk [vmem:[%s2209_s7 + $0x34] sm:$0xf] %vm1323_vm4, %v1685_v33  ;;  %v1150_v39 = vsel %vm349_vm0, %v1106_v32, 0.0  ;;  %v1158_v19 = vsel %vm349_vm0, %v1110_v4, 0.0  ;;  %v1059_v27 = vsel %vm349_vm0, %v2249_v55, 0.0  ;;  %v1113_v22 = vmul.f32 %v2270_v14, %v2270_v14 }
 0x14e   : > { %v965_v37 = vld [vmem:[#allocation2 + $0x70] sm:$0xff]  ;;  %1353 = vst.msk [vmem:[%s2209_s7 + $0x74] sm:$0xf] %vm1323_vm4, %v1701_v15  ;;  %v1151_v54 = vadd.f32 %v1150_v39, %v1149_v36  ;;  %v1160_v23 = vsel %vm349_vm0, %v1111_v9, 0.0  ;;  %v1061_v46 = vsel %vm349_vm0, %v2270_v14, 0.0  ;;  %v1114_v31 = vmul.f32 %v2288_v30, %v2288_v30 }
 0x14f   : > { %v981_v38 = vld [vmem:[#allocation2 + $0xf0] sm:$0xff]  ;;  %v1004_v41 = vadd.f32 %v2195_v2, %v965_v37  ;;  %v1162_v32 = vsel %vm349_vm0, %v1112_v17, 0.0  ;;  %v1063_v55 = vsel %vm349_vm0, %v2288_v30, 0.0  ;;  %v1115_v34 = vmul.f32 %v2312_v52, %v2312_v52 }
 0x150   : > { %v2429_v43 = vadd.f32 %v2195_v2, %v981_v38  ;;  %v966_v47 = vld [vmem:[#allocation2 + $0x78] sm:$0xff]  ;;  %v1164_v15 = vsel %vm349_vm0, %v1113_v22, 0.0  ;;  %v1065_v14 = vsel %vm349_vm0, %v2312_v52, 0.0  ;;  %v1116_v37 = vmul.f32 %v2322_v11, %v2322_v11 }
 0x151   : > { %v982_v48 = vld [vmem:[#allocation2 + $0xf8] sm:$0xff]  ;;  %v1049_v49 = vsel %vm349_vm0, %v1004_v41, 0.0  ;;  %v1107_v50 = vmul.f32 %v1004_v41, %v1004_v41  ;;  %v1686_v51 = vpack.c.bf16 %v1004_v41, %v1004_v41  ;;  %v1005_v53 = vadd.f32 %v2195_v2, %v966_v47 }
 0x152   : > { %v1050_v56 = vadd.f32 %v1049_v49, %v1048_v45  ;;  %v2436_v57 = vadd.f32 %v2195_v2, %v982_v48  ;;  %v1702_v59 = vpack.c.bf16 %v2429_v43, %v2429_v43  ;;  %v1053_v2 = vsel %vm349_vm0, %v2203_v18, 0.0 }
 0x153   : > { %v1152_v60 = vsel %vm349_vm0, %v1107_v50, 0.0  ;;  %1338 = vst.msk [vmem:[%s2209_s7 + $0x38] sm:$0xf] %vm1323_vm4, %v1686_v51  ;;  %v1051_v61 = vsel %vm349_vm0, %v1005_v53, 0.0  ;;  %v1108_v62 = vmul.f32 %v1005_v53, %v1005_v53  ;;  %v1687_v63 = vpack.c.bf16 %v1005_v53, %v1005_v53 }
 0x154   : > { %v1153_v0 = vadd.f32 %v1152_v60, %v1151_v54  ;;  %v1052_v1 = vadd.f32 %v1051_v61, %v1050_v56  ;;  %v1703_v3 = vpack.c.bf16 %v2436_v57, %v2436_v57  ;;  %1354 = vst.msk [vmem:[%s2209_s7 + $0x78] sm:$0xf] %vm1323_vm4, %v1702_v59  ;;  %v1166_v38 = vsel %vm349_vm0, %v1114_v31, 0.0 }
 0x155   : > { %v1154_v5 = vsel %vm349_vm0, %v1108_v62, 0.0  ;;  %1339 = vst.msk [vmem:[%s2209_s7 + $0x3c] sm:$0xf] %vm1323_vm4, %v1687_v63  ;;  %v1067_v30 = vsel %vm349_vm0, %v2322_v11, 0.0  ;;  %v1117_v44 = vmul.f32 %v2344_v42, %v2344_v42  ;;  %v1168_v45 = vsel %vm349_vm0, %v1115_v34, 0.0 }
 0x156   : > { %v1054_v7 = vadd.f32 %v1053_v2, %v1052_v1  ;;  %1355 = vst.msk [vmem:[%s2209_s7 + $0x7c] sm:$0xf] %vm1323_vm4, %v1703_v3  ;;  %v1155_v6 = vadd.f32 %v1154_v5, %v1153_v0  ;;  %v1069_v52 = vsel %vm349_vm0, %v2344_v42, 0.0  ;;  %v1118_v49 = vmul.f32 %v2351_v58, %v2351_v58  ;;  %s1849_s7 = sshll.u32 %s1960_s29, 4  ;;  %s1850_s7 = int_to_ptr.vmem [resolvable:$false] %s1849_s7 }
 0x157   : > { %v1170_v50 = vsel %vm349_vm0, %v1116_v37, 0.0  ;;  %v1071_v11 = vsel %vm349_vm0, %v2351_v58, 0.0  ;;  %v1119_v54 = vmul.f32 %v2373_v24, %v2373_v24  ;;  %v1172_v56 = vsel %vm349_vm0, %v1117_v44, 0.0  ;;  %s1851_s15 = scalar_lea.vmem %s1850_s7, 32  ;;  %p1852_p1 = scmp.lt.s32.totalorder %s2544_s11, %s1850_s7 }
 0x158   : > { %v1056_v18 = vadd.f32 %v1055_v8, %v1054_v7  ;;  %v1157_v13 = vadd.f32 %v1156_v10, %v1155_v6  ;;  %v1073_v42 = vsel %vm349_vm0, %v2373_v24, 0.0  ;;  %v1120_v61 = vmul.f32 %v2380_v40, %v2380_v40  ;;  %p1853_p2 = scmp.lt.s32.totalorder %s1851_s15, %s1845_s13 }
 0x159   : > { %v1174_v62 = vsel %vm349_vm0, %v1118_v49, 0.0  ;;  %v1075_v58 = vsel %vm349_vm0, %v2380_v40, 0.0  ;;  %v1121_v1 = vmul.f32 %v2402_v12, %v2402_v12  ;;  %v1176_v3 = vsel %vm349_vm0, %v1119_v54, 0.0 }
 0x15a   : > { %v1058_v20 = vadd.f32 %v1057_v16, %v1056_v18  ;;  %v1159_v21 = vadd.f32 %v1158_v19, %v1157_v13  ;;  %v1077_v24 = vsel %vm349_vm0, %v2402_v12, 0.0  ;;  %v1122_v5 = vmul.f32 %v2410_v28, %v2410_v28  ;;  %p1854_p3 = por %p1853_p2, %p1852_p1 }
 0x15b   : > { %v1123_v7 = vmul.f32 %v2429_v43, %v2429_v43  ;;  %v1178_v6 = vsel %vm349_vm0, %v1120_v61, 0.0  ;;  %v1079_v9 = vsel %vm349_vm0, %v2410_v28, 0.0  ;;  %v1081_v10 = vsel %vm349_vm0, %v2429_v43, 0.0 }
 0x15c   : > { %v1060_v26 = vadd.f32 %v1059_v27, %v1058_v20  ;;  %v1161_v29 = vadd.f32 %v1160_v23, %v1159_v21  ;;  %v1180_v18 = vsel %vm349_vm0, %v1121_v1, 0.0  ;;  %v1124_v16 = vmul.f32 %v2436_v57, %v2436_v57  ;;  %p1855_p5 = pnand %p1854_p3, %p1848_p0 }
 0x15d   : > { %v1182_v17 = vsel %vm349_vm0, %v1122_v5, 0.0  ;;  %v1184_v19 = vsel %vm349_vm0, %v1123_v7, 0.0  ;;  %v1083_v28 = vsel %vm349_vm0, %v2436_v57, 0.0 }
 0x15e   : > { %v1062_v33 = vadd.f32 %v1061_v46, %v1060_v26  ;;  %v1163_v25 = vadd.f32 %v1162_v32, %v1161_v29  ;;  %v1186_v43 = vsel %vm349_vm0, %v1124_v16, 0.0 }
 0x160   : > { %v1064_v35 = vadd.f32 %v1063_v55, %v1062_v33  ;;  %v1165_v36 = vadd.f32 %v1164_v15, %v1163_v25 }
 0x162   : > { %v1066_v39 = vadd.f32 %v1065_v14, %v1064_v35  ;;  %v1167_v41 = vadd.f32 %v1166_v38, %v1165_v36 }
 0x164   : > { %v1068_v47 = vadd.f32 %v1067_v30, %v1066_v39  ;;  %v1169_v48 = vadd.f32 %v1168_v45, %v1167_v41 }
 0x166   : > { %v1070_v51 = vadd.f32 %v1069_v52, %v1068_v47  ;;  %v1171_v53 = vadd.f32 %v1170_v50, %v1169_v48 }
 0x168   : > { %v1072_v59 = vadd.f32 %v1071_v11, %v1070_v51  ;;  %v1173_v60 = vadd.f32 %v1172_v56, %v1171_v53 }
 0x16a   : > { %v1074_v63 = vadd.f32 %v1073_v42, %v1072_v59  ;;  %v1175_v0 = vadd.f32 %v1174_v62, %v1173_v60 }
 0x16c   : > { %v1076_v2 = vadd.f32 %v1075_v58, %v1074_v63  ;;  %v1177_v4 = vadd.f32 %v1176_v3, %v1175_v0 }
 0x16e   : > { %v1078_v8 = vadd.f32 %v1077_v24, %v1076_v2  ;;  %v1179_v40 = vadd.f32 %v1178_v6, %v1177_v4 }
 0x170   : > { %v1080_v12 = vadd.f32 %v1079_v9, %v1078_v8  ;;  %v1181_v13 = vadd.f32 %v1180_v18, %v1179_v40 }
 0x172   : > { %v1082_v20 = vadd.f32 %v1081_v10, %v1080_v12  ;;  %v1183_v21 = vadd.f32 %v1182_v17, %v1181_v13 }
 0x174   : > { %v1084_v27 = vadd.f32 %v1083_v28, %v1082_v20  ;;  %v1185_v22 = vadd.f32 %v1184_v19, %v1183_v21 }
 0x176   : > { %v1085_v23 = vrot.slane %v1084_v27, 4  ;;  %v1187_v26 = vadd.f32 %v1186_v43, %v1185_v22 }
 0x178   : > { %v1086_v29 = vadd.f32 %v1085_v23, %v1084_v27  ;;  %v1188_v46 = vrot.slane %v1187_v26, 4 }
 0x17a   : > { %v1087_v31 = vrot.slane %v1086_v29, 2  ;;  %v1189_v32 = vadd.f32 %v1188_v46, %v1187_v26 }
 0x17c   : > { %v1088_v33 = vadd.f32 %v1087_v31, %v1086_v29  ;;  %v1190_v25 = vrot.slane %v1189_v32, 2 }
 0x17e   : > { %v1089_v57 = vrot.slane %v1088_v33, 1  ;;  %v1191_v55 = vadd.f32 %v1190_v25, %v1189_v32 }
 0x180   : > { %v1090_v34 = vadd.f32 %v1089_v57, %v1088_v33  ;;  %v1192_v15 = vrot.slane %v1191_v55, 1 }
 0x182   : > { %1092 = vst.msk [vmem:[%s304_s10] sm:$0x1] %vm1091_vm5, %v1090_v34  ;;  %v1193_v35 = vadd.f32 %v1192_v15, %v1191_v55 }
 0x183   : > { %1858 = shalt.err (!%p1855_p5)
}
 0x184   : > { %s1859_s9 = scalar_lea.hbm %s2542_s17, 16  ;;  %s1863_s21 = scalar_lea.hbm %s2627_s4, 64 }
 0x185   : > { %p1860_p6 = scmp.ne.s32.totalorder %s2542_s17, %s1859_s9  ;;  %p1864_p10 = scmp.lt.u32.totalorder %s2542_s17, %s2627_s4 }
 0x186   : > { %p1865_p11 = scmp.lt.u32.totalorder %s1863_s21, %s1859_s9  ;;  %p1867_p13 = scmp.lt.u32.totalorder %s1859_s9, %s2542_s17 }
 0x187   : > { %p1861_p7 = pnand %p1860_p6, %p2032_p4 }
 0x188   : > { %p1866_p12 = por %p1865_p11, %p1864_p10 }
 0x189   : > { %p1862_p9 = pneg %p1861_p7 }
 0x18a   : > { %p1868_p0 = por %p1867_p13, %p1866_p12 }
 0x18c   : > { %p1869_p1 = pnand %p1868_p0, %p1862_p9 }
 0x18e   : > { %1872 = shalt.err (!%p1869_p1)
}
 0x18f   : > { %1724 = dma.vmem_to_hbm [thread:$0]  (%p2032_p4), %s2544_s11, 16, %s2542_s17, %s1365_s27   ;;  %1194 = vst.msk [vmem:[%s310_s12] sm:$0x1] %vm1091_vm5, %v1193_v35 }
 0x190   : > { %s1369_s13 = scalar_lea.sflag [#allocation6], %s2532_s8  ;;  %s1873_s7 = scalar_lea.vmem %s2552_s14, 16 }
 0x191   : > { %p1874_p2 = scmp.ne.s32.totalorder %s2552_s14, %s1873_s7  ;;  %s1961_s15 = smov [#allocation5]  }
 0x192   : > { %s1877_s9 = sshll.u32 %s1961_s15, 4  ;;  %s1878_s9 = int_to_ptr.vmem [resolvable:$false] %s1877_s9 }
 0x193   : > { %p1875_p3 = pnand %p1874_p2, %p2032_p4  ;;  %s1879_s10 = scalar_lea.vmem %s1878_s9, 32 }
 0x194   : > { %p1880_p6 = scmp.lt.s32.totalorder %s2552_s14, %s1878_s9  ;;  %p1881_p7 = scmp.lt.s32.totalorder %s1879_s10, %s1873_s7 }
 0x195   : > { %p1876_p5 = pneg %p1875_p3 }
 0x196   : > { %p1882_p9 = por %p1881_p7, %p1880_p6 }
 0x198   : > { %p1883_p10 = pnand %p1882_p9, %p1876_p5 }
 0x19a   : > { %1886 = shalt.err (!%p1883_p10)
}
 0x19b   : > { %s1887_s8 = scalar_lea.hbm %s2550_s25, 16  ;;  %s1891_s17 = scalar_lea.hbm %s2628_s5, 64 }
 0x19c   : > { %p1888_p11 = scmp.ne.s32.totalorder %s2550_s25, %s1887_s8  ;;  %p1892_p0 = scmp.lt.u32.totalorder %s2550_s25, %s2628_s5 }
 0x19d   : > { %p1893_p1 = scmp.lt.u32.totalorder %s1891_s17, %s1887_s8  ;;  %p1895_p3 = scmp.lt.u32.totalorder %s1887_s8, %s2550_s25 }
 0x19e   : > { %p1889_p12 = pnand %p1888_p11, %p2032_p4 }
 0x19f   : > { %p1894_p2 = por %p1893_p1, %p1892_p0 }
 0x1a0   : > { %p1890_p13 = pneg %p1889_p12 }
 0x1a1   : > { %p1896_p5 = por %p1895_p3, %p1894_p2 }
 0x1a3   : > { %p1897_p6 = pnand %p1896_p5, %p1890_p13 }
 0x1a5   : > { %1900 = shalt.err (!%p1897_p6)
}
 0x1a6   : > { %1725 = dma.vmem_to_hbm [thread:$0]  (%p2032_p4), %s2552_s14, 16, %s2550_s25, %s1369_s13  }
 0x1a7 PF: > { %p1735_p7 = scmp.ge.s32.totalorder %s1955_s23, 2  ;;  %s1423_s21 = sand.u32 1, %s1935_s18  }
 0x1a8   : > { %s1424_s24 = scalar_lea.sflag [#allocation4], %s1423_s21 }
 0x1a9   : > { %p1729_p9 = pnand %p1735_p7, %p2039_p8 }
 0x1ab   : > { %1926 = dma.done.wait (!%p1729_p9), %s1424_s24, 16  }
 0x1ac   : > { %1928 = vsyncadd (!%p1729_p9), %s1424_s24, 4294967280  ;;  %s1432_s29 = scalar_lea.sflag [#allocation6], %s1423_s21 }
 0x1ad   : > { %1930 = dma.done.wait (!%p1729_p9), %s1432_s29, 16  }
 0x1ae   : > { %1932 = vsyncadd (!%p1729_p9), %s1432_s29, 4294967280  ;;  %s22_s23 = sadd.s32 1, %s1955_s23   ;;  %s2631_s18 = smov %s1939_s19 }
 0x1af   : > { %p19_p10 = scmp.ge.s32.totalorder %s22_s23, 6   ;;  %s2632_s19 = smov %s1943_s20 }
 0x1b0   : > { %s2633_s20 = smov %s2045_s6  ;;  %s2634_s21 = smov %s1951_s22 }
 0x1b1   : > { %s2635_s22 = smov %s2637_s26  ;;  %21 = sbr.rel (!%p19_p10) target bundleno = 6 (0x6), region = 110 }
 0x1b8   :  { %1436 = vsyncpa [#allocation4], 1 }
 0x1b9   :  { %1438 = vsyncpa [#allocation4 + $0x1], 1 }
 0x1ba   :  { %1439 = vsyncpa [#allocation6], 1 }
 0x1bb   :  { %1441 = vsyncpa [#allocation6 + $0x1], 1 }

</bundles_post_ra>
